<compile_context>
chip_gen: v7x
topology: tpu7x:2x2x1
jax: 0.10.0
libtpu: 0.0.40
codegen_flags: <defaults>
</compile_context>

<pallas_src>
import functools
import math

import jax
import jax.numpy as jnp
from jax import lax
from jax.experimental import pallas as pl
from jax.experimental.pallas import tpu as pltpu


def _round_up(x, m):
    return ((x + m - 1) // m) * m


# ---------------------------------------------------------------------------
# Pallas kernel: one grid step = (batch block b, L-chunk l)
# ---------------------------------------------------------------------------
def _char_decoder_kernel(gx_ref,      # (Lc, Bb, 4*Hg) f32  precomputed input gates
                         whh_ref,     # (Hg, 4*Hg)     f32  gate-block padded W_hh.T
                         wproj_ref,   # (Hg, Vp)       bf16 W_proj.T padded
                         bproj_ref,   # (1, Vp)        f32
                         h0_ref,      # (Bb, Hg)       f32
                         c0_ref,      # (Bb, Hg)       f32
                         scores_ref,  # (Lc, Bb, Vp)   f32  out (blocked, pipelined)
                         hT_ref,      # (Bb, Hg)       f32  out + carry across L-chunks
                         cT_ref,      # (Bb, Hg)       f32  out + carry across L-chunks
                         hseq_ref,    # scratch (Lc*Bb, Hg) f32
                         *, seq_len, mask_tail):
    Lc, Bb, _ = gx_ref.shape
    Hg = hT_ref.shape[1]
    l = pl.program_id(1)

    # Initialize the carry from the provided initial state on the first chunk.
    @pl.when(l == 0)
    def _():
        hT_ref[...] = h0_ref[...]
        cT_ref[...] = c0_ref[...]

    # State is read ONCE per chunk and then kept in vregs for the whole chunk.
    h = hT_ref[...]
    c = cT_ref[...]
    whh = whh_ref[...]                     # loop-invariant

    # ---- recurrence: only h_prev @ W_hh + gate elementwise stays serial ----
    for t in range(Lc):                    # fully unrolled, static offsets
        gates = gx_ref[t] + jnp.dot(h, whh, preferred_element_type=jnp.float32)
        # lane-aligned gate slices (each gate padded to Hg lanes); order i,f,g,o
        i_g = jax.nn.sigmoid(gates[:, 0 * Hg:1 * Hg])
        f_g = jax.nn.sigmoid(gates[:, 1 * Hg:2 * Hg])
        g_g = jnp.tanh(gates[:, 2 * Hg:3 * Hg])
        o_g = jax.nn.sigmoid(gates[:, 3 * Hg:4 * Hg])
        c_new = f_g * c + i_g * g_g
        h_new = o_g * jnp.tanh(c_new)
        if mask_tail:
            # L was padded up to a multiple of Lc: freeze the carry on padded steps.
            gstep = jnp.full((Bb, Hg), l * Lc + t, jnp.int32)
            c = jnp.where(gstep < seq_len, c_new, c)
            h = jnp.where(gstep < seq_len, h_new, h)
        else:
            c, h = c_new, h_new
        hseq_ref[pl.ds(t * Bb, Bb), :] = h   # stage for the chunk projection

    # carry / final state written once per chunk (not per step)
    hT_ref[...] = h
    cT_ref[...] = c

    # ---- interleaved vocab projection for this chunk (bf16 MXU, f32 acc) ----
    scores = (jnp.dot(hseq_ref[...].astype(jnp.bfloat16), wproj_ref[...],
                      preferred_element_type=jnp.float32)
              + bproj_ref[...])                       # (Lc*Bb, Vp)
    scores_ref[...] = scores.reshape(Lc, Bb, -1)      # lane-dense blocked store


# ---------------------------------------------------------------------------
# Parameter preparation (done once, outside the kernel)
# ---------------------------------------------------------------------------
def prepare_params(params, *, lane=128):
    """Fuse embedding + input gates into a gather table; pad to MXU layouts."""
    emb = params["emb"]                        # (V, E)
    w_ih = params["w_ih"]                      # (4H, E)
    w_hh = params["w_hh"]                      # (4H, H)
    b_g = params["b_ih"] + params["b_hh"]      # (4H,)
    w_proj = params["w_proj"]                  # (V, H)
    b_proj = params["b_proj"]                  # (V,)

    V, E = emb.shape
    H = w_hh.shape[1]
    Vp, Hg = _round_up(V, lane), _round_up(H, lane)

    # Fused table: row v = emb[v] @ W_ih.T + (b_ih + b_hh), gate order i,f,g,o.
    t_raw = emb @ w_ih.T + b_g[None, :]                        # (V, 4H) f32

    gate_tbl = jnp.zeros((V, 4 * Hg), jnp.float32)
    whh_p = jnp.zeros((Hg, 4 * Hg), jnp.float32)
    for k in range(4):   # gate-block padding: each gate gets its own Hg-lane block
        gate_tbl = gate_tbl.at[:, k * Hg:k * Hg + H].set(t_raw[:, k * H:(k + 1) * H])
        whh_p = whh_p.at[:H, k * Hg:k * Hg + H].set(w_hh[k * H:(k + 1) * H, :].T)

    # Projection weight in bf16 (MXU throughput); bias + accumulation stay f32.
    wproj_p = (jnp.zeros((Hg, Vp), jnp.float32)
               .at[:H, :V].set(w_proj.T).astype(jnp.bfloat16))
    bproj_p = jnp.zeros((1, Vp), jnp.float32).at[0, :V].set(b_proj)

    return {"gate_tbl": gate_tbl, "whh": whh_p, "wproj": wproj_p, "bproj": bproj_p,
            "dims": (V, E, H, Vp, Hg)}


# ---------------------------------------------------------------------------
# Wrapper reproducing CharDecoder.forward semantics.
# ---------------------------------------------------------------------------
def char_decoder_forward(ids, pparams, dec_hidden=None, *, l_chunk=8, b_block=8):
    """ids: (L, B) int32. Returns (scores.squeeze(), (h, c)), h/c of shape (1, B, H)."""
    L, B = ids.shape
    V, E, H, Vp, Hg = pparams["dims"]

    Bb = _round_up(b_block, 8)            # batch rows per grid block (sublane aligned)
    Bp = _round_up(B, Bb)
    Lc = max(1, min(l_chunk, L))          # timesteps per grid chunk
    Lp = _round_up(L, Lc)
    NB, NL = Bp // Bb, Lp // Lc
    mask_tail = (Lp != L)

    if dec_hidden is None:
        h0 = jnp.zeros((B, H), jnp.float32)
        c0 = jnp.zeros((B, H), jnp.float32)
    else:
        h0 = dec_hidden[0].reshape(B, H).astype(jnp.float32)
        c0 = dec_hidden[1].reshape(B, H).astype(jnp.float32)

    ids_p = jnp.zeros((Lp, Bp), jnp.int32).at[:L, :B].set(ids.astype(jnp.int32))
    # Hoisted embedding lookup + input-side gate matmul: one XLA gather of the
    # fused table; result streams into the kernel as a pipelined BlockSpec input.
    gx = jnp.take(pparams["gate_tbl"], ids_p, axis=0)          # (Lp, Bp, 4*Hg) f32

    h0_p = jnp.zeros((Bp, Hg), jnp.float32).at[:B, :H].set(h0)
    c0_p = jnp.zeros((Bp, Hg), jnp.float32).at[:B, :H].set(c0)

    kernel = functools.partial(_char_decoder_kernel, seq_len=L, mask_tail=mask_tail)

    scores_p, hT_p, cT_p = pl.pallas_call(
        kernel,
        grid=(NB, NL),   # batch blocks (parallel / megacore), L chunks (carried)
        out_shape=(
            jax.ShapeDtypeStruct((Lp, Bp, Vp), jnp.float32),
            jax.ShapeDtypeStruct((Bp, Hg), jnp.float32),
            jax.ShapeDtypeStruct((Bp, Hg), jnp.float32),
        ),
        in_specs=[
            pl.BlockSpec((Lc, Bb, 4 * Hg), lambda b, l: (l, b, 0)),  # gx
            pl.BlockSpec((Hg, 4 * Hg), lambda b, l: (0, 0)),         # whh
            pl.BlockSpec((Hg, Vp), lambda b, l: (0, 0)),             # wproj (bf16)
            pl.BlockSpec((1, Vp), lambda b, l: (0, 0)),              # bproj
            pl.BlockSpec((Bb, Hg), lambda b, l: (b, 0)),             # h0
            pl.BlockSpec((Bb, Hg), lambda b, l: (b, 0)),             # c0
        ],
        out_specs=(
            pl.BlockSpec((Lc, Bb, Vp), lambda b, l: (l, b, 0)),      # scores (pipelined)
            pl.BlockSpec((Bb, Hg), lambda b, l: (b, 0)),             # hT (resident carry)
            pl.BlockSpec((Bb, Hg), lambda b, l: (b, 0)),             # cT (resident carry)
        ),
        scratch_shapes=[pltpu.VMEM((Lc * Bb, Hg), jnp.float32)],     # per-chunk h slab
        compiler_params=pltpu.CompilerParams(
            dimension_semantics=("parallel", "arbitrary")),
    )(gx, pparams["whh"], pparams["wproj"], pparams["bproj"], h0_p, c0_p)

    scores = scores_p[:L, :B, :V]
    hT = hT_p[:B, :H]
    cT = cT_p[:B, :H]
    # PyTorch `.squeeze()` removes all size-1 dims.
    return jnp.squeeze(scores), (hT[None], cT[None])


# ---------------------------------------------------------------------------
# Pure-JAX reference (for correctness check only).
# ---------------------------------------------------------------------------
def _reference(ids, params, h0, c0):
    emb = params["emb"][ids]                   # (L, B, E)
    H = params["w_hh"].shape[1]
    wih_t = params["w_ih"].T
    whh_t = params["w_hh"].T
    b = (params["b_ih"] + params["b_hh"])[None, :]
    wproj_t = params["w_proj"].T
    bproj = params["b_proj"][None, :]

    def step(carry, x_t):
        h, c = carry
        gates = x_t @ wih_t + h @ whh_t + b
        i = jax.nn.sigmoid(gates[:, 0 * H:1 * H])
        f = jax.nn.sigmoid(gates[:, 1 * H:2 * H])
        g = jnp.tanh(gates[:, 2 * H:3 * H])
        o = jax.nn.sigmoid(gates[:, 3 * H:4 * H])
        c = f * c + i * g
        h = o * jnp.tanh(c)
        s = h @ wproj_t + bproj
        return (h, c), s

    (hT, cT), scores = lax.scan(step, (h0, c0), emb)
    return scores, hT, cT


# ---------------------------------------------------------------------------
# Deterministic parameter initialization (shapes per CharDecoder.__init__).
# ---------------------------------------------------------------------------
def init_params(key, vocab_size, char_emb_size, hidden_size, pad_idx=0):
    ks = jax.random.split(key, 7)
    k = 1.0 / math.sqrt(hidden_size)
    u = lambda kk, shape: jax.random.uniform(kk, shape, jnp.float32, -k, k)

    emb = jax.random.normal(ks[0], (vocab_size, char_emb_size), jnp.float32)
    emb = emb.at[pad_idx].set(0.0)                      # padding_idx row = 0
    return {
        "emb": emb,
        "w_ih": u(ks[1], (4 * hidden_size, char_emb_size)),   # nn.LSTM weight_ih_l0
        "w_hh": u(ks[2], (4 * hidden_size, hidden_size)),     # nn.LSTM weight_hh_l0
        "b_ih": u(ks[3], (4 * hidden_size,)),
        "b_hh": u(ks[4], (4 * hidden_size,)),
        "w_proj": u(ks[5], (vocab_size, hidden_size)),        # nn.Linear weight
        "b_proj": u(ks[6], (vocab_size,)),
    }


if __name__ == "__main__":
    L, B = 8, 4            # (length, batch_size)
    H, E, V = 32, 50, 30   # hidden_size, char_embedding_size, len(char2id)

    key = jax.random.PRNGKey(0)
    kp, ki, kh, kc, ki2 = jax.random.split(key, 5)
    params = init_params(kp, V, E, H)
    pparams = prepare_params(params)

    ids = jax.random.randint(ki, (L, B), 0, V, dtype=jnp.int32)
    h0 = jax.random.normal(kh, (1, B, H), jnp.float32)
    c0 = jax.random.normal(kc, (1, B, H), jnp.float32)

    # Check 1: provided dec_hidden, 2 L-chunks (exercises carried recurrence +
    # per-chunk interleaved projection), batch padded 4 -> 8.
    scores, (hT, cT) = char_decoder_forward(ids, pparams, (h0, c0), l_chunk=4)
    jax.block_until_ready((scores, hT, cT))

    ref_scores, ref_h, ref_c = _reference(ids, params, h0[0], c0[0])
    # scores use a bf16 projection weight -> looser tolerance; h/c stay full f32.
    assert jnp.allclose(scores, jnp.squeeze(ref_scores), atol=3e-2), "scores mismatch"
    assert jnp.allclose(hT[0], ref_h, atol=2e-4), "h mismatch"
    assert jnp.allclose(cT[0], ref_c, atol=2e-4), "c mismatch"

    # Check 2: dec_hidden=None, L not a multiple of the chunk (exercises the
    # masked-tail path), different batch size.
    L2, B2 = 12, 3
    ids2 = jax.random.randint(ki2, (L2, B2), 0, V, dtype=jnp.int32)
    scores2, (hT2, cT2) = char_decoder_forward(ids2, pparams, None)
    jax.block_until_ready((scores2, hT2, cT2))

    zero = jnp.zeros((B2, H), jnp.float32)
    ref_scores2, ref_h2, ref_c2 = _reference(ids2, params, zero, zero)
    assert jnp.allclose(scores2, jnp.squeeze(ref_scores2), atol=3e-2), "scores2 mismatch"
    assert jnp.allclose(hT2[0], ref_h2, atol=2e-4), "h2 mismatch"
    assert jnp.allclose(cT2[0], ref_c2, atol=2e-4), "c2 mismatch"

    print("KERNEL_OK")
</pallas_src>

<mosaic_0001>
module attributes {stable_mosaic.version = 11 : i64} {
  func.func @_char_decoder_kernel(%arg0: i32, %arg1: i32, %arg2: memref<4x8x512xf32, #tpu.memory_space<vmem>>, %arg3: memref<128x512xf32, #tpu.memory_space<vmem>>, %arg4: memref<128x128xbf16, #tpu.memory_space<vmem>>, %arg5: memref<1x128xf32, #tpu.memory_space<vmem>>, %arg6: memref<8x128xf32, #tpu.memory_space<vmem>>, %arg7: memref<8x128xf32, #tpu.memory_space<vmem>>, %arg8: memref<4x8x128xf32, #tpu.memory_space<vmem>>, %arg9: memref<8x128xf32, #tpu.memory_space<vmem>>, %arg10: memref<8x128xf32, #tpu.memory_space<vmem>>, %arg11: memref<32x128xf32, #tpu.memory_space<vmem>>) attributes {dimension_semantics = [#tpu.dimension_semantics<parallel>, #tpu.dimension_semantics<arbitrary>], iteration_bounds = array<i64: 1, 2>, scalar_prefetch = 0 : i64, scratch_operands = 1 : i64, tpu.core_type = #tpu.core_type<tc>, window_params = [{transform_indices = @transform_0, window_bounds = array<i64: 4, 8, 512>}, {pipeline_mode = #tpu.pipeline_mode<synchronous>, transform_indices = @transform_1, window_bounds = array<i64: 128, 512>}, {pipeline_mode = #tpu.pipeline_mode<synchronous>, transform_indices = @transform_2, window_bounds = array<i64: 128, 128>}, {pipeline_mode = #tpu.pipeline_mode<synchronous>, transform_indices = @transform_3, window_bounds = array<i64: 1, 128>}, {transform_indices = @transform_4, window_bounds = array<i64: 8, 128>}, {transform_indices = @transform_5, window_bounds = array<i64: 8, 128>}, {transform_indices = @transform_6, window_bounds = array<i64: 4, 8, 128>}, {transform_indices = @transform_7, window_bounds = array<i64: 8, 128>}, {transform_indices = @transform_8, window_bounds = array<i64: 8, 128>}]} {
    %c0_i32 = arith.constant 0 : i32
    %0 = arith.cmpi eq, %arg1, %c0_i32 : i32
    %1 = arith.extui %0 : i1 to i32
    %c0_i32_0 = arith.constant 0 : i32
    %2 = arith.cmpi ne, %1, %c0_i32_0 : i32
    scf.if %2 {
      %c0_49 = arith.constant 0 : index
      %c0_50 = arith.constant 0 : index
      %137 = vector.load %arg6[%c0_49, %c0_50] : memref<8x128xf32, #tpu.memory_space<vmem>>, vector<8x128xf32>
      %c0_51 = arith.constant 0 : index
      %c0_52 = arith.constant 0 : index
      %138 = vector.load %arg9[%c0_51, %c0_52] : memref<8x128xf32, #tpu.memory_space<vmem>>, vector<8x128xf32>
      tpu.vector_store %arg9[%c0_51, %c0_52], %137 {strides = array<i32>} : memref<8x128xf32, #tpu.memory_space<vmem>>, vector<8x128xf32>,
      %c0_53 = arith.constant 0 : index
      %c0_54 = arith.constant 0 : index
      %139 = vector.load %arg7[%c0_53, %c0_54] : memref<8x128xf32, #tpu.memory_space<vmem>>, vector<8x128xf32>
      %c0_55 = arith.constant 0 : index
      %c0_56 = arith.constant 0 : index
      %140 = vector.load %arg10[%c0_55, %c0_56] : memref<8x128xf32, #tpu.memory_space<vmem>>, vector<8x128xf32>
      tpu.vector_store %arg10[%c0_55, %c0_56], %139 {strides = array<i32>} : memref<8x128xf32, #tpu.memory_space<vmem>>, vector<8x128xf32>,
    } else {
    }
    %c0 = arith.constant 0 : index
    %c0_1 = arith.constant 0 : index
    %3 = vector.load %arg9[%c0, %c0_1] : memref<8x128xf32, #tpu.memory_space<vmem>>, vector<8x128xf32>
    %c0_2 = arith.constant 0 : index
    %c0_3 = arith.constant 0 : index
    %4 = vector.load %arg10[%c0_2, %c0_3] : memref<8x128xf32, #tpu.memory_space<vmem>>, vector<8x128xf32>
    %c0_4 = arith.constant 0 : index
    %c0_5 = arith.constant 0 : index
    %5 = vector.load %arg3[%c0_4, %c0_5] : memref<128x512xf32, #tpu.memory_space<vmem>>, vector<128x512xf32>
    %c0_6 = arith.constant 0 : index
    %c0_7 = arith.constant 0 : index
    %c0_8 = arith.constant 0 : index
    %6 = vector.load %arg2[%c0_6, %c0_7, %c0_8] : memref<4x8x512xf32, #tpu.memory_space<vmem>>, vector<1x8x512xf32>
    %7 = vector.shape_cast %6 : vector<1x8x512xf32> to vector<8x512xf32>
    %cst = arith.constant dense<0.000000e+00> : vector<8x512xf32>
    %8 = tpu.matmul %3, %5, %cst {dimension_numbers = #tpu.dot_dimension_numbers<[1], [0], [0], [1], [0, 0, 1, 1], [], []>} : vector<8x128xf32>, vector<128x512xf32>, vector<8x512xf32> -> vector<8x512xf32>
    %9 = arith.addf %7, %8 : vector<8x512xf32>
    %10 = vector.extract_strided_slice %9 {offsets = [0, 0], sizes = [8, 128], strides = [1, 1]} : vector<8x512xf32> to vector<8x128xf32>
    %11 = arith.negf %10 : vector<8x128xf32>
    %12 = math.exp %11 : vector<8x128xf32>
    %cst_9 = arith.constant 1.000000e+00 : f32
    %13 = vector.broadcast %cst_9 : f32 to vector<8x128xf32>
    %14 = arith.addf %13, %12 : vector<8x128xf32>
    %15 = arith.divf %13, %14 : vector<8x128xf32>
    %16 = vector.extract_strided_slice %9 {offsets = [0, 128], sizes = [8, 128], strides = [1, 1]} : vector<8x512xf32> to vector<8x128xf32>
    %17 = arith.negf %16 : vector<8x128xf32>
    %18 = math.exp %17 : vector<8x128xf32>
    %cst_10 = arith.constant 1.000000e+00 : f32
    %19 = vector.broadcast %cst_10 : f32 to vector<8x128xf32>
    %20 = arith.addf %19, %18 : vector<8x128xf32>
    %21 = arith.divf %19, %20 : vector<8x128xf32>
    %22 = vector.extract_strided_slice %9 {offsets = [0, 256], sizes = [8, 128], strides = [1, 1]} : vector<8x512xf32> to vector<8x128xf32>
    %23 = math.tanh %22 : vector<8x128xf32>
    %24 = vector.extract_strided_slice %9 {offsets = [0, 384], sizes = [8, 128], strides = [1, 1]} : vector<8x512xf32> to vector<8x128xf32>
    %25 = arith.negf %24 : vector<8x128xf32>
    %26 = math.exp %25 : vector<8x128xf32>
    %cst_11 = arith.constant 1.000000e+00 : f32
    %27 = vector.broadcast %cst_11 : f32 to vector<8x128xf32>
    %28 = arith.addf %27, %26 : vector<8x128xf32>
    %29 = arith.divf %27, %28 : vector<8x128xf32>
    %30 = arith.mulf %21, %4 : vector<8x128xf32>
    %31 = arith.mulf %15, %23 : vector<8x128xf32>
    %32 = arith.addf %30, %31 : vector<8x128xf32>
    %33 = math.tanh %32 : vector<8x128xf32>
    %34 = arith.mulf %29, %33 : vector<8x128xf32>
    %c0_12 = arith.constant 0 : index
    %c0_13 = arith.constant 0 : index
    %35 = vector.load %arg11[%c0_12, %c0_13] : memref<32x128xf32, #tpu.memory_space<vmem>>, vector<8x128xf32>
    tpu.vector_store %arg11[%c0_12, %c0_13], %34 {strides = array<i32>} : memref<32x128xf32, #tpu.memory_space<vmem>>, vector<8x128xf32>,
    %c1 = arith.constant 1 : index
    %c0_14 = arith.constant 0 : index
    %c0_15 = arith.constant 0 : index
    %36 = vector.load %arg2[%c1, %c0_14, %c0_15] : memref<4x8x512xf32, #tpu.memory_space<vmem>>, vector<1x8x512xf32>
    %37 = vector.shape_cast %36 : vector<1x8x512xf32> to vector<8x512xf32>
    %cst_16 = arith.constant dense<0.000000e+00> : vector<8x512xf32>
    %38 = tpu.matmul %34, %5, %cst_16 {dimension_numbers = #tpu.dot_dimension_numbers<[1], [0], [0], [1], [0, 0, 1, 1], [], []>} : vector<8x128xf32>, vector<128x512xf32>, vector<8x512xf32> -> vector<8x512xf32>
    %39 = arith.addf %37, %38 : vector<8x512xf32>
    %40 = vector.extract_strided_slice %39 {offsets = [0, 0], sizes = [8, 128], strides = [1, 1]} : vector<8x512xf32> to vector<8x128xf32>
    %41 = arith.negf %40 : vector<8x128xf32>
    %42 = math.exp %41 : vector<8x128xf32>
    %cst_17 = arith.constant 1.000000e+00 : f32
    %43 = vector.broadcast %cst_17 : f32 to vector<8x128xf32>
    %44 = arith.addf %43, %42 : vector<8x128xf32>
    %45 = arith.divf %43, %44 : vector<8x128xf32>
    %46 = vector.extract_strided_slice %39 {offsets = [0, 128], sizes = [8, 128], strides = [1, 1]} : vector<8x512xf32> to vector<8x128xf32>
    %47 = arith.negf %46 : vector<8x128xf32>
    %48 = math.exp %47 : vector<8x128xf32>
    %cst_18 = arith.constant 1.000000e+00 : f32
    %49 = vector.broadcast %cst_18 : f32 to vector<8x128xf32>
    %50 = arith.addf %49, %48 : vector<8x128xf32>
    %51 = arith.divf %49, %50 : vector<8x128xf32>
    %52 = vector.extract_strided_slice %39 {offsets = [0, 256], sizes = [8, 128], strides = [1, 1]} : vector<8x512xf32> to vector<8x128xf32>
    %53 = math.tanh %52 : vector<8x128xf32>
    %54 = vector.extract_strided_slice %39 {offsets = [0, 384], sizes = [8, 128], strides = [1, 1]} : vector<8x512xf32> to vector<8x128xf32>
    %55 = arith.negf %54 : vector<8x128xf32>
    %56 = math.exp %55 : vector<8x128xf32>
    %cst_19 = arith.constant 1.000000e+00 : f32
    %57 = vector.broadcast %cst_19 : f32 to vector<8x128xf32>
    %58 = arith.addf %57, %56 : vector<8x128xf32>
    %59 = arith.divf %57, %58 : vector<8x128xf32>
    %60 = arith.mulf %51, %32 : vector<8x128xf32>
    %61 = arith.mulf %45, %53 : vector<8x128xf32>
    %62 = arith.addf %60, %61 : vector<8x128xf32>
    %63 = math.tanh %62 : vector<8x128xf32>
    %64 = arith.mulf %59, %63 : vector<8x128xf32>
    %c8 = arith.constant 8 : index
    %c0_20 = arith.constant 0 : index
    %65 = vector.load %arg11[%c8, %c0_20] : memref<32x128xf32, #tpu.memory_space<vmem>>, vector<8x128xf32>
    tpu.vector_store %arg11[%c8, %c0_20], %64 {strides = array<i32>} : memref<32x128xf32, #tpu.memory_space<vmem>>, vector<8x128xf32>,
    %c2 = arith.constant 2 : index
    %c0_21 = arith.constant 0 : index
    %c0_22 = arith.constant 0 : index
    %66 = vector.load %arg2[%c2, %c0_21, %c0_22] : memref<4x8x512xf32, #tpu.memory_space<vmem>>, vector<1x8x512xf32>
    %67 = vector.shape_cast %66 : vector<1x8x512xf32> to vector<8x512xf32>
    %cst_23 = arith.constant dense<0.000000e+00> : vector<8x512xf32>
    %68 = tpu.matmul %64, %5, %cst_23 {dimension_numbers = #tpu.dot_dimension_numbers<[1], [0], [0], [1], [0, 0, 1, 1], [], []>} : vector<8x128xf32>, vector<128x512xf32>, vector<8x512xf32> -> vector<8x512xf32>
    %69 = arith.addf %67, %68 : vector<8x512xf32>
    %70 = vector.extract_strided_slice %69 {offsets = [0, 0], sizes = [8, 128], strides = [1, 1]} : vector<8x512xf32> to vector<8x128xf32>
    %71 = arith.negf %70 : vector<8x128xf32>
    %72 = math.exp %71 : vector<8x128xf32>
    %cst_24 = arith.constant 1.000000e+00 : f32
    %73 = vector.broadcast %cst_24 : f32 to vector<8x128xf32>
    %74 = arith.addf %73, %72 : vector<8x128xf32>
    %75 = arith.divf %73, %74 : vector<8x128xf32>
    %76 = vector.extract_strided_slice %69 {offsets = [0, 128], sizes = [8, 128], strides = [1, 1]} : vector<8x512xf32> to vector<8x128xf32>
    %77 = arith.negf %76 : vector<8x128xf32>
    %78 = math.exp %77 : vector<8x128xf32>
    %cst_25 = arith.constant 1.000000e+00 : f32
    %79 = vector.broadcast %cst_25 : f32 to vector<8x128xf32>
    %80 = arith.addf %79, %78 : vector<8x128xf32>
    %81 = arith.divf %79, %80 : vector<8x128xf32>
    %82 = vector.extract_strided_slice %69 {offsets = [0, 256], sizes = [8, 128], strides = [1, 1]} : vector<8x512xf32> to vector<8x128xf32>
    %83 = math.tanh %82 : vector<8x128xf32>
    %84 = vector.extract_strided_slice %69 {offsets = [0, 384], sizes = [8, 128], strides = [1, 1]} : vector<8x512xf32> to vector<8x128xf32>
    %85 = arith.negf %84 : vector<8x128xf32>
    %86 = math.exp %85 : vector<8x128xf32>
    %cst_26 = arith.constant 1.000000e+00 : f32
    %87 = vector.broadcast %cst_26 : f32 to vector<8x128xf32>
    %88 = arith.addf %87, %86 : vector<8x128xf32>
    %89 = arith.divf %87, %88 : vector<8x128xf32>
    %90 = arith.mulf %81, %62 : vector<8x128xf32>
    %91 = arith.mulf %75, %83 : vector<8x128xf32>
    %92 = arith.addf %90, %91 : vector<8x128xf32>
    %93 = math.tanh %92 : vector<8x128xf32>
    %94 = arith.mulf %89, %93 : vector<8x128xf32>
    %c16 = arith.constant 16 : index
    %c0_27 = arith.constant 0 : index
    %95 = vector.load %arg11[%c16, %c0_27] : memref<32x128xf32, #tpu.memory_space<vmem>>, vector<8x128xf32>
    tpu.vector_store %arg11[%c16, %c0_27], %94 {strides = array<i32>} : memref<32x128xf32, #tpu.memory_space<vmem>>, vector<8x128xf32>,
    %c3 = arith.constant 3 : index
    %c0_28 = arith.constant 0 : index
    %c0_29 = arith.constant 0 : index
    %96 = vector.load %arg2[%c3, %c0_28, %c0_29] : memref<4x8x512xf32, #tpu.memory_space<vmem>>, vector<1x8x512xf32>
    %97 = vector.shape_cast %96 : vector<1x8x512xf32> to vector<8x512xf32>
    %cst_30 = arith.constant dense<0.000000e+00> : vector<8x512xf32>
    %98 = tpu.matmul %94, %5, %cst_30 {dimension_numbers = #tpu.dot_dimension_numbers<[1], [0], [0], [1], [0, 0, 1, 1], [], []>} : vector<8x128xf32>, vector<128x512xf32>, vector<8x512xf32> -> vector<8x512xf32>
    %99 = arith.addf %97, %98 : vector<8x512xf32>
    %100 = vector.extract_strided_slice %99 {offsets = [0, 0], sizes = [8, 128], strides = [1, 1]} : vector<8x512xf32> to vector<8x128xf32>
    %101 = arith.negf %100 : vector<8x128xf32>
    %102 = math.exp %101 : vector<8x128xf32>
    %cst_31 = arith.constant 1.000000e+00 : f32
    %103 = vector.broadcast %cst_31 : f32 to vector<8x128xf32>
    %104 = arith.addf %103, %102 : vector<8x128xf32>
    %105 = arith.divf %103, %104 : vector<8x128xf32>
    %106 = vector.extract_strided_slice %99 {offsets = [0, 128], sizes = [8, 128], strides = [1, 1]} : vector<8x512xf32> to vector<8x128xf32>
    %107 = arith.negf %106 : vector<8x128xf32>
    %108 = math.exp %107 : vector<8x128xf32>
    %cst_32 = arith.constant 1.000000e+00 : f32
    %109 = vector.broadcast %cst_32 : f32 to vector<8x128xf32>
    %110 = arith.addf %109, %108 : vector<8x128xf32>
    %111 = arith.divf %109, %110 : vector<8x128xf32>
    %112 = vector.extract_strided_slice %99 {offsets = [0, 256], sizes = [8, 128], strides = [1, 1]} : vector<8x512xf32> to vector<8x128xf32>
    %113 = math.tanh %112 : vector<8x128xf32>
    %114 = vector.extract_strided_slice %99 {offsets = [0, 384], sizes = [8, 128], strides = [1, 1]} : vector<8x512xf32> to vector<8x128xf32>
    %115 = arith.negf %114 : vector<8x128xf32>
    %116 = math.exp %115 : vector<8x128xf32>
    %cst_33 = arith.constant 1.000000e+00 : f32
    %117 = vector.broadcast %cst_33 : f32 to vector<8x128xf32>
    %118 = arith.addf %117, %116 : vector<8x128xf32>
    %119 = arith.divf %117, %118 : vector<8x128xf32>
    %120 = arith.mulf %111, %92 : vector<8x128xf32>
    %121 = arith.mulf %105, %113 : vector<8x128xf32>
    %122 = arith.addf %120, %121 : vector<8x128xf32>
    %123 = math.tanh %122 : vector<8x128xf32>
    %124 = arith.mulf %119, %123 : vector<8x128xf32>
    %c24 = arith.constant 24 : index
    %c0_34 = arith.constant 0 : index
    %125 = vector.load %arg11[%c24, %c0_34] : memref<32x128xf32, #tpu.memory_space<vmem>>, vector<8x128xf32>
    tpu.vector_store %arg11[%c24, %c0_34], %124 {strides = array<i32>} : memref<32x128xf32, #tpu.memory_space<vmem>>, vector<8x128xf32>,
    %c0_35 = arith.constant 0 : index
    %c0_36 = arith.constant 0 : index
    %126 = vector.load %arg9[%c0_35, %c0_36] : memref<8x128xf32, #tpu.memory_space<vmem>>, vector<8x128xf32>
    tpu.vector_store %arg9[%c0_35, %c0_36], %124 {strides = array<i32>} : memref<8x128xf32, #tpu.memory_space<vmem>>, vector<8x128xf32>,
    %c0_37 = arith.constant 0 : index
    %c0_38 = arith.constant 0 : index
    %127 = vector.load %arg10[%c0_37, %c0_38] : memref<8x128xf32, #tpu.memory_space<vmem>>, vector<8x128xf32>
    tpu.vector_store %arg10[%c0_37, %c0_38], %122 {strides = array<i32>} : memref<8x128xf32, #tpu.memory_space<vmem>>, vector<8x128xf32>,
    %c0_39 = arith.constant 0 : index
    %c0_40 = arith.constant 0 : index
    %128 = vector.load %arg11[%c0_39, %c0_40] : memref<32x128xf32, #tpu.memory_space<vmem>>, vector<32x128xf32>
    %129 = arith.truncf %128 : vector<32x128xf32> to vector<32x128xbf16>
    %c0_41 = arith.constant 0 : index
    %c0_42 = arith.constant 0 : index
    %130 = vector.load %arg4[%c0_41, %c0_42] : memref<128x128xbf16, #tpu.memory_space<vmem>>, vector<128x128xbf16>
    %cst_43 = arith.constant dense<0.000000e+00> : vector<32x128xf32>
    %131 = tpu.matmul %129, %130, %cst_43 {dimension_numbers = #tpu.dot_dimension_numbers<[1], [0], [0], [1], [0, 0, 1, 1], [], []>} : vector<32x128xbf16>, vector<128x128xbf16>, vector<32x128xf32> -> vector<32x128xf32>
    %c0_44 = arith.constant 0 : index
    %c0_45 = arith.constant 0 : index
    %132 = vector.load %arg5[%c0_44, %c0_45] : memref<1x128xf32, #tpu.memory_space<vmem>>, vector<1x128xf32>
    %133 = vector.broadcast %132 : vector<1x128xf32> to vector<32x128xf32>
    %134 = arith.addf %131, %133 : vector<32x128xf32>
    %135 = vector.shape_cast %134 : vector<32x128xf32> to vector<4x8x128xf32>
    %c0_46 = arith.constant 0 : index
    %c0_47 = arith.constant 0 : index
    %c0_48 = arith.constant 0 : index
    %136 = vector.load %arg8[%c0_46, %c0_47, %c0_48] : memref<4x8x128xf32, #tpu.memory_space<vmem>>, vector<4x8x128xf32>
    tpu.vector_store %arg8[%c0_46, %c0_47, %c0_48], %135 {strides = array<i32>} : memref<4x8x128xf32, #tpu.memory_space<vmem>>, vector<4x8x128xf32>,
    return
  }
  func.func @transform_0(%arg0: i32, %arg1: i32) -> (i32, i32, i32) {
    %c0_i32 = arith.constant 0 : i32
    %c0_i32_0 = arith.constant 0 : i32
    return %arg1, %arg0, %c0_i32 : i32, i32, i32
  }
  func.func @transform_1(%arg0: i32, %arg1: i32) -> (i32, i32) {
    %c0_i32 = arith.constant 0 : i32
    %c0_i32_0 = arith.constant 0 : i32
    %c0_i32_1 = arith.constant 0 : i32
    return %c0_i32, %c0_i32_0 : i32, i32
  }
  func.func @transform_2(%arg0: i32, %arg1: i32) -> (i32, i32) {
    %c0_i32 = arith.constant 0 : i32
    %c0_i32_0 = arith.constant 0 : i32
    %c0_i32_1 = arith.constant 0 : i32
    return %c0_i32, %c0_i32_0 : i32, i32
  }
  func.func @transform_3(%arg0: i32, %arg1: i32) -> (i32, i32) {
    %c0_i32 = arith.constant 0 : i32
    %c0_i32_0 = arith.constant 0 : i32
    %c0_i32_1 = arith.constant 0 : i32
    return %c0_i32, %c0_i32_0 : i32, i32
  }
  func.func @transform_4(%arg0: i32, %arg1: i32) -> (i32, i32) {
    %c0_i32 = arith.constant 0 : i32
    %c0_i32_0 = arith.constant 0 : i32
    return %arg0, %c0_i32 : i32, i32
  }
  func.func @transform_5(%arg0: i32, %arg1: i32) -> (i32, i32) {
    %c0_i32 = arith.constant 0 : i32
    %c0_i32_0 = arith.constant 0 : i32
    return %arg0, %c0_i32 : i32, i32
  }
  func.func @transform_6(%arg0: i32, %arg1: i32) -> (i32, i32, i32) {
    %c0_i32 = arith.constant 0 : i32
    %c0_i32_0 = arith.constant 0 : i32
    return %arg1, %arg0, %c0_i32 : i32, i32, i32
  }
  func.func @transform_7(%arg0: i32, %arg1: i32) -> (i32, i32) {
    %c0_i32 = arith.constant 0 : i32
    %c0_i32_0 = arith.constant 0 : i32
    return %arg0, %c0_i32 : i32, i32
  }
  func.func @transform_8(%arg0: i32, %arg1: i32) -> (i32, i32) {
    %c0_i32 = arith.constant 0 : i32
    %c0_i32_0 = arith.constant 0 : i32
    return %arg0, %c0_i32 : i32, i32
  }
}

</mosaic_0001>

<bundles_post_ra>
// kernel: tpu_custom_call.1
= control target key start
LH: loop header
LB: loop body
LE: loop exit
PB: predicated region body
PF: predicated region fallthrough
CT: control target
= control target key end

     0   :  { %s2902_s0 = inlined_call_operand.hbm [shape: f32[8,8,512], index: 0, kind: input, shape index: {}]   ;;  %s2903_s1 = inlined_call_operand.hbm [shape: f32[128,512], index: 1, kind: input, shape index: {}]   ;;  %s2904_s2 = inlined_call_operand.hbm [shape: bf16[128,128], index: 2, kind: input, shape index: {}]   ;;  %s2905_s3 = inlined_call_operand.vmem [shape: f32[1,128], index: 3, kind: input, shape index: {}]   ;;  %s2906_s4 = inlined_call_operand.vmem [shape: f32[8,128], index: 4, kind: input, shape index: {}]   ;;  %s2907_s5 = inlined_call_operand.vmem [shape: f32[8,128], index: 5, kind: input, shape index: {}]   ;;  %s2908_s6 = inlined_call_operand.hbm [shape: f32[8,8,128], index: 6, kind: output, shape index: {0}]   ;;  %s2909_s7 = inlined_call_operand.hbm [shape: f32[8,128], index: 7, kind: output, shape index: {1}]   ;;  %s2910_s8 = inlined_call_operand.hbm [shape: f32[8,128], index: 8, kind: output, shape index: {2}]  }
   0x1   :  { %2922 = sst [smem:[#allocation19_spill]] %s2908_s6 }
   0x2   :  { %14 = vsyncpa [#allocation4], 0 }
   0x3   :  { %16 = vsyncpa [#allocation4 + $0x1], 0 }
   0x4   :  { %17 = vsyncpa [#allocation7], 0 }
   0x5   :  { %18 = vsyncpa [#allocation5], 0 }
   0x6   :  { %20 = vsyncpa [#allocation5 + $0x1], 0 }
   0x7   :  { %21 = vsyncpa [#allocation11], 0  ;;  %s2338_s27 = smov 0   ;;  %s2340_s28 = smov 0  }
   0x8   :  { %s2342_s29 = smov 0   ;;  %s2344_s30 = smov 0  }
   0x9   :  { %s2346_s9 = smov 0   ;;  %s2348_s10 = smov 0  }
   0xa LB: > { %2923 = sst [smem:[#allocation17_spill]] %s2258_s27  ;;  %s1525_s11 = sadd.s32 4294967295, %s2278_s10   ;;  %s2278_s10 = sphi %s2348_s10, %s27_s10   ;;  %s2274_s9 = sphi %s2346_s9, %s2948_s9   ;;  %s2270_s30 = sphi %s2344_s30, %s2947_s30   ;;  %s2266_s29 = sphi %s2342_s29, %s2946_s29   ;;  %s2262_s28 = sphi %s2340_s28, %s2945_s28   ;;  %s2258_s27 = sphi %s2338_s27, %s2944_s27  }
   0xb   : > { %s1526_s12 = sadd.s32 4294967294, %s2278_s10   ;;  %p61_p0 = scmp.ne.s32.totalorder %s2262_s28, %s2258_s27 }
   0xc   : > { %p2372_p1 = scmp.eq.s32.totalorder %s1525_s11, 0  ;;  %p2376_p2 = scmp.eq.s32.totalorder %s1525_s11, 1 }
   0xd   : > { %p208_p3 = scmp.eq.s32.totalorder %s1526_s12, 1  ;;  %p1527_p5 = scmp.ge.s32.totalorder %s2278_s10, 1 }
   0xe   : > { %s2924_s13 = scalar_select %p2372_p1, 1, 0 }
   0xf   : > { %s2925_s14 = scalar_select %p2376_p2, 1, 0 }
  0x10   : > { %p2382_p4 = por %p2372_p1, %p61_p0  ;;  %p2387_p6 = por %p208_p3, %p61_p0 }
  0x11   : > { %p267_p7 = scmp.lt.s32.totalorder %s2278_s10, 3  ;;  %s2280_s18 = smov [#allocation6]  }
  0x12   : > { %s2926_s15 = scalar_select %p2382_p4, 1, 0 }
  0x13   : > { %s2927_s16 = scalar_select %p2387_p6, 1, 0 }
  0x14   : > { %p2392_p8 = pnand %p1527_p5, %p267_p7  ;;  %s279_s19 = sshll.u32 %s2280_s18, 4  ;;  %s2396_s19 = int_to_ptr.vmem [resolvable:$true] %s279_s19 }
  0x15   : > { %2928 = sst [smem:[#allocation18_spill]] %s2927_s16  ;;  %s2281_s21 = smov [#allocation8]  }
  0x16   : > { %p1894_p9 = pneg %p2392_p8  ;;  %s292_s22 = sshll.u32 %s2281_s21, 4  ;;  %s2407_s22 = int_to_ptr.vmem [resolvable:$true] %s292_s22 }
  0x17   : > { %s2050_s25 = scalar_lea.hbm %s2903_s1, 8192 }
  0x18   : > { %p2403_p11 = pnand %p1894_p9, %p2372_p1  ;;  %p2051_p12 = scmp.ne.s32.totalorder %s2903_s1, %s2050_s25 }
  0x19   : > { %p2057_p5 = scmp.lt.u32.totalorder %s2050_s25, %s2903_s1 }
  0x1a   : > { %p2052_p13 = pneg %p2403_p11 }
  0x1c   : > { %p2053_p0 = pnand %p2052_p13, %p2051_p12 }
  0x1e   : > { %p2054_p3 = pneg %p2053_p0 }
  0x20   : > { %p2059_p7 = pnand %p2057_p5, %p2054_p3 }
  0x22   : > { %2062 = shalt.err (!%p2059_p7)
}
  0x23   : > { %s2063_s21 = scalar_lea.vmem %s2396_s19, 8192  ;;  %p2071_p1 = scmp.lt.s32.totalorder %s2396_s19, %s2396_s19 }
  0x24   : > { %p2064_p9 = scmp.ne.s32.totalorder %s2396_s19, %s2063_s21  ;;  %p2072_p12 = scmp.lt.s32.totalorder %s2063_s21, %s2063_s21 }
  0x26   : > { %p2066_p10 = pnand %p2064_p9, %p2052_p13  ;;  %p2073_p0 = por %p2072_p12, %p2071_p1 }
  0x28   : > { %p2067_p6 = pneg %p2066_p10 }
  0x2a   : > { %p2074_p4 = pnand %p2073_p0, %p2067_p6 }
  0x2c   : > { %2077 = shalt.err (!%p2074_p4)
}
  0x2d   : > { %s2917_s23 = smov 512   ;;  %s2918_s24 = smov 32  }
  0x2e   : > { %1897 = dma.hbm_to_vmem [thread:$0]  (!%p2403_p11), %s2903_s1, 8192, %s2396_s19, [#allocation7], %s2917_s23, %s2917_s23, %s2918_s24  }
  0x2f   : > { %s2078_s18 = scalar_lea.hbm %s2904_s2, 1024 }
  0x30   : > { %p2079_p1 = scmp.ne.s32.totalorder %s2904_s2, %s2078_s18  ;;  %p2085_p10 = scmp.lt.u32.totalorder %s2078_s18, %s2904_s2 }
  0x32   : > { %p2081_p4 = pnand %p2079_p1, %p2052_p13 }
  0x34   : > { %p2082_p6 = pneg %p2081_p4 }
  0x36   : > { %p2087_p3 = pnand %p2085_p10, %p2082_p6 }
  0x38   : > { %2090 = shalt.err (!%p2087_p3)
}
  0x39   : > { %s2091_s19 = scalar_lea.vmem %s2407_s22, 1024  ;;  %p2099_p12 = scmp.lt.s32.totalorder %s2407_s22, %s2407_s22 }
  0x3a   : > { %p2092_p5 = scmp.ne.s32.totalorder %s2407_s22, %s2091_s19  ;;  %p2100_p0 = scmp.lt.s32.totalorder %s2091_s19, %s2091_s19 }
  0x3c   : > { %p2094_p7 = pnand %p2092_p5, %p2052_p13  ;;  %p2101_p1 = por %p2100_p0, %p2099_p12 }
  0x3e   : > { %p2095_p9 = pneg %p2094_p7 }
  0x40   : > { %p2102_p4 = pnand %p2101_p1, %p2095_p9 }
  0x42   : > { %2105 = shalt.err (!%p2102_p4)
}
  0x43   : > { %s2284_s6 = smov 64   ;;  %s2285_s27 = smov 4  }
  0x44   : > { %1900 = dma.hbm_to_vmem [thread:$0]  (!%p2403_p11), %s2904_s2, 1024, %s2407_s22, [#allocation7], %s2284_s6, %s2284_s6, %s2285_s27  }
  0x45   : > { %s36_s26 = sadd.s32 1, %s2274_s9  ;;  %s48_s11 = sadd.s32 1, %s2266_s29 }
  0x46   : > { %p37_p13 = scmp.ge.s32.totalorder %s36_s26, 2  ;;  %p55_p6 = scmp.ne.s32.totalorder %s2266_s29, %s2262_s28 }
  0x47   : > { %p56_p10 = scmp.eq.s32.totalorder %s2278_s10, 0  ;;  %p1911_p3 = scmp.lt.s32.totalorder %s2278_s10, 2 }
  0x48   : > { %s2950_s26 = smov (%p37_p13, %s36_s26), 0  ;;  %p2474_p7 = por %p2376_p2, %p55_p6 }
  0x49   : > { %p57_p5 = por %p56_p10, %p55_p6  ;;  %s43_s20 = ssub.s32 %s2274_s9, %s2950_s26 }
  0x4a   : > { %s2931_s12 = scalar_select %p2474_p7, 1, 0 }
  0x4b   : > { %s323_s18 = sand.u32 1, %s2266_s29   ;;  %p46_p9 = scmp.eq.s32.totalorder %s43_s20, 0 }
  0x4c   : > { %s1533_s22 = sshll.u32 %s323_s18, 7  ;;  %s1586_s21 = sshll.u32 %s2274_s9, 11 }
  0x4d   : > { %s2483_s19 = scalar_select %p46_p9, %s2266_s29, %s48_s11  }
  0x4e   : > { %s2488_s16 = scalar_lea.hbm %s2902_s0, %s1586_s21  ;;  %s327_s25 = scalar_lea.vmem [#allocation3], %s1533_s22 }
  0x4f   : > { %s337_s23 = sshll.u32 %s327_s25, 4  ;;  %p2492_p11 = pnand %p1911_p3, %p57_p5  ;;  %s2496_s23 = int_to_ptr.vmem [resolvable:$true] %s337_s23 }
  0x50   : > { %s2498_s11 = scalar_lea.sflag [#allocation4], %s323_s18  ;;  %s2106_s20 = scalar_lea.hbm %s2488_s16, 2048 }
  0x51   : > { %p2107_p12 = scmp.ne.s32.totalorder %s2488_s16, %s2106_s20  ;;  %p2108_p0 = pneg %p2492_p11 }
  0x52   : > { %s2111_s6 = scalar_lea.hbm %s2902_s0, 4096  ;;  %p2112_p13 = scmp.lt.u32.totalorder %s2488_s16, %s2902_s0 }
  0x53   : > { %p2109_p1 = pnand %p2108_p0, %p2107_p12  ;;  %p2113_p6 = scmp.lt.u32.totalorder %s2111_s6, %s2106_s20 }
  0x54   : > { %p2115_p3 = scmp.lt.u32.totalorder %s2106_s20, %s2488_s16 }
  0x55   : > { %p2110_p4 = pneg %p2109_p1  ;;  %p2114_p10 = por %p2113_p6, %p2112_p13 }
  0x57   : > { %p2116_p5 = por %p2115_p3, %p2114_p10 }
  0x59   : > { %p2117_p9 = pnand %p2116_p5, %p2110_p4 }
  0x5b   : > { %2120 = shalt.err (!%p2117_p9)
}
  0x5c   : > { %s2121_s18 = scalar_lea.vmem %s2496_s23, 2048  ;;  %s2286_s22 = smov [#allocation3]  }
  0x5d   : > { %p2122_p12 = scmp.ne.s32.totalorder %s2496_s23, %s2121_s18  ;;  %s2126_s21 = sshll.u32 %s2286_s22, 4  ;;  %s2127_s21 = int_to_ptr.vmem [resolvable:$false] %s2126_s21 }
  0x5e   : > { %s2128_s27 = scalar_lea.vmem %s2127_s21, 4096  ;;  %p2129_p2 = scmp.lt.s32.totalorder %s2496_s23, %s2127_s21 }
  0x5f   : > { %p2124_p1 = pnand %p2122_p12, %p2108_p0  ;;  %p2130_p13 = scmp.lt.s32.totalorder %s2128_s27, %s2121_s18 }
  0x61   : > { %p2125_p7 = pneg %p2124_p1  ;;  %p2131_p6 = por %p2130_p13, %p2129_p2 }
  0x63   : > { %p2132_p10 = pnand %p2131_p6, %p2125_p7 }
  0x65   : > { %2135 = shalt.err (!%p2132_p10)
}
  0x66   : > { %s2933_s20 = smov 32   ;;  %s2934_s6 = smov 512  }
  0x67   : > { %1904 = dma.hbm_to_vmem [thread:$0]  (!%p2492_p11), %s2488_s16, 2048, %s2496_s23, %s2498_s11, %s2934_s6, %s2934_s6, %s2933_s20  }
  0x68   : > { %349 = sbr.rel (%p2392_p8) target bundleno = 1445 (0x5a5), region = 44  ;;  %s2532_s25 = sand.u32 (!%p2392_p8), 1, %s2262_s28  }
  0x69   : > { %s1538_s18 = sshll.u32 (!%p2392_p8), %s2532_s25, 7  ;;  %s352_s22 = scalar_lea.sflag (!%p2392_p8), [#allocation4], %s2532_s25 }
  0x6a   : > { %s2536_s21 = scalar_lea.vmem (!%p2392_p8), [#allocation3], %s1538_s18  ;;  %p2935_p2 = scmp.ne.s32.totalorder (!%p2392_p8), %s2926_s15, 0 }
  0x6f   : > { %2241 = dma.done.wait (%p2935_p2), %s352_s22, 2048  }
  0x70   : > { %2243 = vsyncadd (%p2935_p2), %s352_s22, 4294965248  ;;  %p2936_p7 = scmp.ne.s32.totalorder %s2924_s13, 0 }
  0x72   : > { %2245 = dma.done.wait (%p2936_p7), [#allocation7], 9216  }
  0x73   : > { %2247 = vsyncadd (%p2936_p7), [#allocation7], 4294958080  ;;  %s1541_s17 = sshll.u32 %s2532_s25, 5  ;;  %p1542_p8 = scmp.ne.s32.totalorder %s2270_s30, 0 }
  0x74   : > { %s2547_s23 = scalar_lea.vmem [#allocation9], %s1541_s17  ;;  %v419_v0 = vld [vmem:[%s2906_s4] sm:$0xff] (!%p1542_p8) }
  0x75   : > { %418 = sbr.rel (%p1542_p8) target bundleno = 124 (0x7c), region = 60  ;;  %v421_v1 = vld [vmem:[%s2907_s5] sm:$0xff] (!%p1542_p8)  ;;  %420 = vst [vmem:[#allocation10] sm:$0xff] (!%p1542_p8), %v419_v0 }
  0x76   : > { %422 = vst [vmem:[#allocation12] sm:$0xff] (!%p1542_p8), %v421_v1 }
  0x7c PF: > { %v426_v2 = vld [vmem:[#allocation6 + $0x8] sm:$0xff]  ;;  %v425_v4 = vld [vmem:[#allocation6] sm:$0xff]  ;;  %v2287_v9 = vmov 0.0   ;;  %v428_v49 = vld [vmem:[#allocation6 + $0x18] sm:$0xff]  ;;  %s2288_s13 = smov [#allocation10]   ;;  %p2937_p0 = scmp.ne.s32.totalorder %s2925_s14, 0 }
  0x7d   : > { %v430_v3 = vld [vmem:[#allocation6 + $0x28] sm:$0xff]  ;;  %v429_v6 = vld [vmem:[#allocation6 + $0x20] sm:$0xff]  ;;  %557 = vmatprep.mubr.f32.mxu1 %v2287_v9  ;;  %733 = vmatprep.mubr.f32.mxu0 %v2287_v9  ;;  %v432_v50 = vld [vmem:[#allocation6 + $0x38] sm:$0xff]  ;;  %s1355_s27 = sshll.u32 %s2288_s13, 4  ;;  %s1356_s27 = int_to_ptr.vmem [resolvable:$true] %s1355_s27 }
  0x7e   : > { %v2556_v5 = vpack.c.bf16 %v430_v3, %v426_v2  ;;  %v434_v7 = vld [vmem:[#allocation6 + $0x48] sm:$0xff]  ;;  %v2560_v10 = vpack.c.bf16 %v429_v6, %v425_v4  ;;  %v433_v12 = vld [vmem:[#allocation6 + $0x40] sm:$0xff]  ;;  %v2619_v53 = vpack.c.bf16 %v432_v50, %v428_v49  ;;  %v427_v54 = vld [vmem:[#allocation6 + $0x10] sm:$0xff]  ;;  %s2136_s20 = scalar_lea.vmem %s1356_s27, 128  ;;  %p2143_p5 = scmp.lt.s32.totalorder %s1356_s27, %s1356_s27 }
  0x7f   : > { %v438_v8 = vld [vmem:[#allocation6 + $0x68] sm:$0xff]  ;;  %v437_v13 = vld [vmem:[#allocation6 + $0x60] sm:$0xff]  ;;  %v431_v55 = vld [vmem:[#allocation6 + $0x30] sm:$0xff]  ;;  %p2137_p11 = scmp.ne.s32.totalorder %s1356_s27, %s2136_s20  ;;  %p2144_p9 = scmp.lt.s32.totalorder %s2136_s20, %s2136_s20 }
  0x80   : > { %v2562_v11 = vpack.c.bf16 %v438_v8, %v434_v7  ;;  %v442_v14 = vld [vmem:[#allocation6 + $0x88] sm:$0xff]  ;;  %1619 = vmatprep.subr.bf16.mxu1 %v2556_v5  ;;  %1683 = vmatprep.subr.bf16.mxu0 %v2556_v5  ;;  %v2567_v16 = vpack.c.bf16 %v437_v13, %v433_v12  ;;  %v441_v18 = vld [vmem:[#allocation6 + $0x80] sm:$0xff]  ;;  %v436_v56 = vld [vmem:[#allocation6 + $0x58] sm:$0xff]  ;;  %v2623_v59 = vpack.c.bf16 %v431_v55, %v427_v54 }
  0x81   : > { %v446_v15 = vld [vmem:[#allocation6 + $0xa8] sm:$0xff]  ;;  %1621 = vmatpush1.bf16.msra.mxu1 %v2560_v10  ;;  %1685 = vmatpush1.bf16.msra.mxu0 %v2560_v10  ;;  %v445_v19 = vld [vmem:[#allocation6 + $0xa0] sm:$0xff]  ;;  %v440_v57 = vld [vmem:[#allocation6 + $0x78] sm:$0xff]  ;;  %p2138_p4 = pnand %p2137_p11, %p2937_p0  ;;  %p2145_p12 = por %p2144_p9, %p2143_p5 }
  0x82   : > { %1623 = vmatprep.subr.bf16.mxu1 %v2562_v11  ;;  %v2571_v17 = vpack.c.bf16 %v446_v15, %v442_v14  ;;  %1687 = vmatprep.subr.bf16.mxu0 %v2562_v11  ;;  %v450_v20 = vld [vmem:[#allocation6 + $0xc8] sm:$0xff]  ;;  %v2575_v22 = vpack.c.bf16 %v445_v19, %v441_v18  ;;  %v449_v24 = vld [vmem:[#allocation6 + $0xc0] sm:$0xff]  ;;  %v2627_v60 = vpack.c.bf16 %v440_v57, %v436_v56  ;;  %v435_v61 = vld [vmem:[#allocation6 + $0x50] sm:$0xff] }
  0x83   : > { %v454_v21 = vld [vmem:[#allocation6 + $0xe8] sm:$0xff]  ;;  %v453_v25 = vld [vmem:[#allocation6 + $0xe0] sm:$0xff]  ;;  %v439_v62 = vld [vmem:[#allocation6 + $0x70] sm:$0xff]  ;;  %p2139_p3 = pneg %p2138_p4 }
  0x84   : > { %v2579_v23 = vpack.c.bf16 %v454_v21, %v450_v20  ;;  %v458_v26 = vld [vmem:[#allocation6 + $0x108] sm:$0xff]  ;;  %v2583_v28 = vpack.c.bf16 %v453_v25, %v449_v24  ;;  %v457_v30 = vld [vmem:[#allocation6 + $0x100] sm:$0xff]  ;;  %v444_v63 = vld [vmem:[#allocation6 + $0x98] sm:$0xff]  ;;  %v2631_v1 = vpack.c.bf16 %v439_v62, %v435_v61 }
  0x85   : > { %1625 = vmatpush1.bf16.msra.mxu1 %v2567_v16  ;;  %1689 = vmatpush1.bf16.msra.mxu0 %v2567_v16  ;;  %v462_v27 = vld [vmem:[#allocation6 + $0x128] sm:$0xff]  ;;  %v461_v31 = vld [vmem:[#allocation6 + $0x120] sm:$0xff]  ;;  %v448_v0 = vld [vmem:[#allocation6 + $0xb8] sm:$0xff]  ;;  %p2146_p1 = pnand %p2145_p12, %p2139_p3 }
  0x86   : > { %1627 = vmatprep.subr.bf16.mxu1 %v2571_v17  ;;  %1691 = vmatprep.subr.bf16.mxu0 %v2571_v17  ;;  %v2587_v29 = vpack.c.bf16 %v462_v27, %v458_v26  ;;  %v466_v32 = vld [vmem:[#allocation6 + $0x148] sm:$0xff]  ;;  %v2591_v34 = vpack.c.bf16 %v461_v31, %v457_v30  ;;  %v465_v36 = vld [vmem:[#allocation6 + $0x140] sm:$0xff]  ;;  %v2635_v2 = vpack.c.bf16 %v448_v0, %v444_v63  ;;  %v443_v3 = vld [vmem:[#allocation6 + $0x90] sm:$0xff] }
  0x87   : > { %v470_v33 = vld [vmem:[#allocation6 + $0x168] sm:$0xff]  ;;  %v469_v37 = vld [vmem:[#allocation6 + $0x160] sm:$0xff]  ;;  %v447_v4 = vld [vmem:[#allocation6 + $0xb0] sm:$0xff] }
  0x88   : > { %v2595_v35 = vpack.c.bf16 %v470_v33, %v466_v32  ;;  %v474_v38 = vld [vmem:[#allocation6 + $0x188] sm:$0xff]  ;;  %v2599_v40 = vpack.c.bf16 %v469_v37, %v465_v36  ;;  %v473_v41 = vld [vmem:[#allocation6 + $0x180] sm:$0xff]  ;;  %v452_v6 = vld [vmem:[#allocation6 + $0xd8] sm:$0xff]  ;;  %v2638_v8 = vpack.c.bf16 %v447_v4, %v443_v3 }
  0x89   : > { %1629 = vmatpush1.bf16.msra.mxu1 %v2575_v22  ;;  %1693 = vmatpush1.bf16.msra.mxu0 %v2575_v22  ;;  %v478_v39 = vld [vmem:[#allocation6 + $0x1a8] sm:$0xff]  ;;  %v477_v43 = vld [vmem:[#allocation6 + $0x1a0] sm:$0xff]  ;;  %v456_v7 = vld [vmem:[#allocation6 + $0xf8] sm:$0xff] }
  0x8a   : > { %1631 = vmatprep.subr.bf16.mxu1 %v2579_v23  ;;  %1695 = vmatprep.subr.bf16.mxu0 %v2579_v23  ;;  %v2603_v42 = vpack.c.bf16 %v478_v39, %v474_v38  ;;  %v482_v44 = vld [vmem:[#allocation6 + $0x1c8] sm:$0xff]  ;;  %v481_v46 = vld [vmem:[#allocation6 + $0x1c0] sm:$0xff]  ;;  %v2607_v48 = vpack.c.bf16 %v477_v43, %v473_v41  ;;  %v2641_v12 = vpack.c.bf16 %v456_v7, %v452_v6  ;;  %v451_v13 = vld [vmem:[#allocation6 + $0xd0] sm:$0xff] }
  0x8b   : > { %v486_v45 = vld [vmem:[#allocation6 + $0x1e8] sm:$0xff]  ;;  %v485_v47 = vld [vmem:[#allocation6 + $0x1e0] sm:$0xff]  ;;  %v455_v14 = vld [vmem:[#allocation6 + $0xf0] sm:$0xff] }
  0x8c   : > { %v2611_v51 = vpack.c.bf16 %v486_v45, %v482_v44  ;;  %v2615_v52 = vpack.c.bf16 %v485_v47, %v481_v46  ;;  %v423_v58 = vld [vmem:[#allocation10] sm:$0xff]  ;;  %v460_v15 = vld [vmem:[#allocation6 + $0x118] sm:$0xff]  ;;  %v2644_v19 = vpack.c.bf16 %v455_v14, %v451_v13  ;;  %v459_v21 = vld [vmem:[#allocation6 + $0x110] sm:$0xff] }
  0x8d   : > { %1633 = vmatpush1.bf16.msra.mxu1 %v2583_v28  ;;  %1697 = vmatpush1.bf16.msra.mxu0 %v2583_v28  ;;  %v464_v18 = vld [vmem:[#allocation6 + $0x138] sm:$0xff]  ;;  %v463_v24 = vld [vmem:[#allocation6 + $0x130] sm:$0xff]  ;;  %v490_v56 = vld [vmem:[%s2536_s21 + $0x8] sm:$0xff] }
  0x8e   : > { %1635 = vmatprep.subr.bf16.mxu1 %v2587_v29  ;;  %1699 = vmatprep.subr.bf16.mxu0 %v2587_v29  ;;  %v2647_v20 = vpack.c.bf16 %v464_v18, %v460_v15  ;;  %v468_v25 = vld [vmem:[#allocation6 + $0x158] sm:$0xff]  ;;  %v2650_v27 = vpack.c.bf16 %v463_v24, %v459_v21  ;;  %v467_v31 = vld [vmem:[#allocation6 + $0x150] sm:$0xff]  ;;  %v489_v57 = vld [vmem:[%s2536_s21] sm:$0xff] }
  0x8f   : > { %v472_v26 = vld [vmem:[#allocation6 + $0x178] sm:$0xff]  ;;  %v471_v32 = vld [vmem:[#allocation6 + $0x170] sm:$0xff] }
  0x90   : > { %v2653_v30 = vpack.c.bf16 %v472_v26, %v468_v25  ;;  %v476_v33 = vld [vmem:[#allocation6 + $0x198] sm:$0xff]  ;;  %v2656_v37 = vpack.c.bf16 %v471_v32, %v467_v31  ;;  %v475_v39 = vld [vmem:[#allocation6 + $0x190] sm:$0xff]  ;;  %v424_v26 = vld [vmem:[#allocation12] sm:$0xff] }
  0x91   : > { %1637 = vmatpush1.bf16.msra.mxu1 %v2591_v34  ;;  %1701 = vmatpush1.bf16.msra.mxu0 %v2591_v34  ;;  %v480_v36 = vld [vmem:[#allocation6 + $0x1b8] sm:$0xff]  ;;  %v479_v41 = vld [vmem:[#allocation6 + $0x1b0] sm:$0xff] }
  0x92   : > { %1639 = vmatprep.subr.bf16.mxu1 %v2595_v35  ;;  %1703 = vmatprep.subr.bf16.mxu0 %v2595_v35  ;;  %v2659_v38 = vpack.c.bf16 %v480_v36, %v476_v33  ;;  %v484_v43 = vld [vmem:[#allocation6 + $0x1d8] sm:$0xff]  ;;  %v2662_v45 = vpack.c.bf16 %v479_v41, %v475_v39  ;;  %v483_v47 = vld [vmem:[#allocation6 + $0x1d0] sm:$0xff] }
  0x93   : > { %v488_v44 = vld [vmem:[#allocation6 + $0x1f8] sm:$0xff]  ;;  %v487_v49 = vld [vmem:[#allocation6 + $0x1f0] sm:$0xff] }
  0x94   : > { %v2665_v46 = vpack.c.bf16 %v488_v44, %v484_v43  ;;  %v2668_v50 = vpack.c.bf16 %v487_v49, %v483_v47  ;;  %v491_v7 = vld [vmem:[%s2536_s21 + $0x10] sm:$0xff]  ;;  %v492_v13 = vld [vmem:[%s2536_s21 + $0x18] sm:$0xff] }
  0x95   : > { %1641 = vmatpush1.bf16.msra.mxu1 %v2599_v40  ;;  %1705 = vmatpush1.bf16.msra.mxu0 %v2599_v40 }
  0x96   : > { %1643 = vmatprep.subr.bf16.mxu1 %v2603_v42  ;;  %1707 = vmatprep.subr.bf16.mxu0 %v2603_v42 }
  0x99   : > { %1645 = vmatpush1.bf16.msra.mxu1 %v2607_v48  ;;  %1709 = vmatpush1.bf16.msra.mxu0 %v2607_v48 }
  0x9a   : > { %1647 = vmatprep.subr.bf16.mxu1 %v2611_v51  ;;  %1711 = vmatprep.subr.bf16.mxu0 %v2611_v51 }
  0x9d   : > { %1649 = vmatpush1.bf16.msra.mxu1 %v2615_v52  ;;  %1713 = vmatpush1.bf16.msra.mxu0 %v2615_v52 }
  0x9e   : > { %1651 = vmatprep.subr.bf16.mxu1 %v2619_v53  ;;  %1747 = vmatprep.subr.bf16.mxu0 %v2556_v5 }
  0xa0   : > { %558 = vmatmul.mubr.f32.vlgmr.msra.gmra.mrb[0].mxu1 %v423_v58 }
  0xa1   : > { %1653 = vmatpush1.bf16.msra.mxu1 %v2623_v59  ;;  %628 = vmatprep.mubr.f32.mxu1 %v2287_v9 }
  0xa2   : > { %1655 = vmatprep.subr.bf16.mxu1 %v2627_v60 }
  0xa5   : > { %1657 = vmatpush1.bf16.msra.mxu1 %v2631_v1 }
  0xa6   : > { %1659 = vmatprep.subr.bf16.mxu1 %v2635_v2 }
  0xa9   : > { %1661 = vmatpush1.bf16.msra.mxu1 %v2638_v8 }
  0xaa   : > { %1663 = vmatprep.subr.bf16.mxu1 %v2641_v12 }
  0xad   : > { %1665 = vmatpush1.bf16.msra.mxu1 %v2644_v19 }
  0xae   : > { %1667 = vmatprep.subr.bf16.mxu1 %v2647_v20 }
  0xb1   : > { %1669 = vmatpush1.bf16.msra.mxu1 %v2650_v27 }
  0xb2   : > { %1671 = vmatprep.subr.bf16.mxu1 %v2653_v30 }
  0xb5   : > { %1673 = vmatpush1.bf16.msra.mxu1 %v2656_v37 }
  0xb6   : > { %1675 = vmatprep.subr.bf16.mxu1 %v2659_v38 }
  0xb9   : > { %1677 = vmatpush1.bf16.msra.mxu1 %v2662_v45 }
  0xba   : > { %1679 = vmatprep.subr.bf16.mxu1 %v2665_v46 }
  0xbd   : > { %1681 = vmatpush1.bf16.msra.mxu1 %v2668_v50 }
  0xbe   : > { %1715 = vmatprep.subr.bf16.mxu1 %v2619_v53 }
  0xc0   : > { %629 = vmatmul.mubr.f32.vlgmr.msra.gmra.mrb[2].mxu1 %v423_v58 }
  0xc1   : > { %1717 = vmatpush1.bf16.msra.mxu1 %v2623_v59  ;;  %804 = vmatprep.mubr.f32.mxu1 %v2287_v9 }
  0xc2   : > { %1719 = vmatprep.subr.bf16.mxu1 %v2627_v60 }
  0xc5   : > { %1721 = vmatpush1.bf16.msra.mxu1 %v2631_v1 }
  0xc6   : > { %1723 = vmatprep.subr.bf16.mxu1 %v2635_v2 }
  0xc9   : > { %1725 = vmatpush1.bf16.msra.mxu1 %v2638_v8 }
  0xca   : > { %1727 = vmatprep.subr.bf16.mxu1 %v2641_v12 }
  0xcd   : > { %1729 = vmatpush1.bf16.msra.mxu1 %v2644_v19 }
  0xce   : > { %1731 = vmatprep.subr.bf16.mxu1 %v2647_v20 }
  0xd1   : > { %1733 = vmatpush1.bf16.msra.mxu1 %v2650_v27 }
  0xd2   : > { %1735 = vmatprep.subr.bf16.mxu1 %v2653_v30 }
  0xd5   : > { %1737 = vmatpush1.bf16.msra.mxu1 %v2656_v37 }
  0xd6   : > { %1739 = vmatprep.subr.bf16.mxu1 %v2659_v38 }
  0xd9   : > { %1741 = vmatpush1.bf16.msra.mxu1 %v2662_v45 }
  0xda   : > { %1743 = vmatprep.subr.bf16.mxu1 %v2665_v46 }
  0xdd   : > { %1745 = vmatpush1.bf16.msra.mxu1 %v2668_v50 }
  0xde   : > { %1779 = vmatprep.subr.bf16.mxu1 %v2619_v53 }
 0x173   : > { %v559_v54 = vpop.f32.mrb[0].mxu1 }
 0x174   : > { %v561_v55 = vpop.f32.mrb[1].mxu1  ;;  %v635_v61 = vadd.f32 %v559_v54, %v489_v57  ;;  %v1546_v54 = vld [vmem:[%s2536_s21 + $0x20] sm:$0xff] }
 0x175   : > { %v636_v58 = vadd.f32 %v561_v55, %v490_v56  ;;  %v1547_v55 = vld [vmem:[%s2536_s21 + $0x28] sm:$0xff] }
 0x176   : > { %v1543_v63 = vmul.f32 -1.442695, %v635_v61 }
 0x177   : > { %v1544_v62 = vmul.f32 -1.442695, %v636_v58 }
 0x179   : > { %1986 = vpow2.f32 %v1544_v62 }
 0x17a   : > { %1988 = vpow2.f32 %v1543_v63 }
 0x183   : > { %v1987_v0 = vpop.eup %1986 }
 0x184   : > { %v1989_v3 = vpop.eup %1988  ;;  %v648_v4 = vadd.f32 1.0, %v1987_v0 }
 0x185   : > { %v642_v6 = vadd.f32 1.0, %v1989_v3 }
 0x186   : > { %1990 = vrcp.f32 %v648_v4  ;;  %v1549_v4 = vld [vmem:[%s2536_s21 + $0x38] sm:$0xff] }
 0x187   : > { %1992 = vrcp.f32 %v642_v6 }
 0x190   : > { %v1991_v25 = vpop.eup %1990 }
 0x191   : > { %v1993_v31 = vpop.eup %1992  ;;  %v658_v33 = vmul.f32 %v1991_v25, %v424_v26 }
 0x193   : > { %v630_v14 = vpop.f32.mrb[2].mxu1 }
 0x194   : > { %v637_v15 = vadd.f32 %v630_v14, %v491_v7  ;;  %v632_v18 = vpop.f32.mrb[3].mxu1  ;;  %v1548_v7 = vld [vmem:[%s2536_s21 + $0x30] sm:$0xff] }
 0x195   : > { %v638_v21 = vadd.f32 %v632_v18, %v492_v13 }
 0x196   : > { %1994 = vtanh.f32 %v637_v15 }
 0x197   : > { %v1545_v24 = vmul.f32 -1.442695, %v638_v21 }
 0x199   : > { %1996 = vpow2.f32 %v1545_v24 }
 0x1a0   : > { %v1995_v32 = vpop.eup %1994 }
 0x1a1   : > { %v659_v36 = vmul.f32 %v1995_v32, %v1993_v31 }
 0x1a3   : > { %v1997_v39 = vpop.eup %1996  ;;  %v2694_v41 = vadd.f32 %v659_v36, %v658_v33 }
 0x1a4   : > { %v655_v43 = vadd.f32 1.0, %v1997_v39 }
 0x1a5   : > { %1998 = vtanh.f32 %v2694_v41 }
 0x1a6   : > { %2000 = vrcp.f32 %v655_v43 }
 0x1af   : > { %v1999_v44 = vpop.eup %1998 }
 0x1b0   : > { %v2001_v47 = vpop.eup %2000 }
 0x1b1   : > { %v2697_v49 = vmul.f32 %v2001_v47, %v1999_v44  ;;  %v1979_v47 = vld [vmem:[#allocation8 + $0x8] sm:$0xff]  }
 0x1b3   : > { %734 = vmatmul.mubr.f32.vlgmr.msra.gmra.mrb[0].mxu0 %v2697_v49  ;;  %805 = vmatmul.mubr.f32.vlgmr.msra.gmra.mrb[4].mxu1 %v2697_v49 }
 0x1b4   : > { %1749 = vmatpush1.bf16.msra.mxu0 %v2560_v10  ;;  %1781 = vmatpush1.bf16.msra.mxu1 %v2623_v59 }
 0x1b5   : > { %1751 = vmatprep.subr.bf16.mxu0 %v2562_v11  ;;  %1783 = vmatprep.subr.bf16.mxu1 %v2627_v60 }
 0x1b6   : > { %909 = vmatprep.mubr.f32.mxu0 %v2287_v9  ;;  %980 = vmatprep.mubr.f32.mxu1 %v2287_v9 }
 0x1b8   : > { %1753 = vmatpush1.bf16.msra.mxu0 %v2567_v16  ;;  %1785 = vmatpush1.bf16.msra.mxu1 %v2631_v1 }
 0x1b9   : > { %1755 = vmatprep.subr.bf16.mxu0 %v2571_v17  ;;  %1787 = vmatprep.subr.bf16.mxu1 %v2635_v2 }
 0x1bc   : > { %1757 = vmatpush1.bf16.msra.mxu0 %v2575_v22  ;;  %1789 = vmatpush1.bf16.msra.mxu1 %v2638_v8 }
 0x1bd   : > { %1759 = vmatprep.subr.bf16.mxu0 %v2579_v23  ;;  %1791 = vmatprep.subr.bf16.mxu1 %v2641_v12 }
 0x1c0   : > { %1761 = vmatpush1.bf16.msra.mxu0 %v2583_v28  ;;  %1793 = vmatpush1.bf16.msra.mxu1 %v2644_v19 }
 0x1c1   : > { %1763 = vmatprep.subr.bf16.mxu0 %v2587_v29  ;;  %1795 = vmatprep.subr.bf16.mxu1 %v2647_v20 }
 0x1c4   : > { %1765 = vmatpush1.bf16.msra.mxu0 %v2591_v34  ;;  %1797 = vmatpush1.bf16.msra.mxu1 %v2650_v27 }
 0x1c5   : > { %1767 = vmatprep.subr.bf16.mxu0 %v2595_v35  ;;  %1799 = vmatprep.subr.bf16.mxu1 %v2653_v30 }
 0x1c8   : > { %1769 = vmatpush1.bf16.msra.mxu0 %v2599_v40  ;;  %1801 = vmatpush1.bf16.msra.mxu1 %v2656_v37 }
 0x1c9   : > { %1771 = vmatprep.subr.bf16.mxu0 %v2603_v42  ;;  %1803 = vmatprep.subr.bf16.mxu1 %v2659_v38 }
 0x1cc   : > { %1773 = vmatpush1.bf16.msra.mxu0 %v2607_v48  ;;  %1805 = vmatpush1.bf16.msra.mxu1 %v2662_v45 }
 0x1cd   : > { %1775 = vmatprep.subr.bf16.mxu0 %v2611_v51  ;;  %1807 = vmatprep.subr.bf16.mxu1 %v2665_v46 }
 0x1d0   : > { %1777 = vmatpush1.bf16.msra.mxu0 %v2615_v52  ;;  %1809 = vmatpush1.bf16.msra.mxu1 %v2668_v50 }
 0x1d1   : > { %1811 = vmatprep.subr.bf16.mxu0 %v2556_v5  ;;  %1843 = vmatprep.subr.bf16.mxu1 %v2619_v53 }
 0x286   : > { %v735_v56 = vpop.f32.mrb[0].mxu0  ;;  %v806_v57 = vpop.f32.mrb[4].mxu1 }
 0x287   : > { %v811_v58 = vadd.f32 %v1546_v54, %v735_v56  ;;  %v737_v61 = vpop.f32.mrb[1].mxu0  ;;  %v808_v62 = vpop.f32.mrb[5].mxu1  ;;  %v813_v5 = vadd.f32 %v1548_v7, %v806_v57  ;;  %v1980_v54 = vld [vmem:[#allocation8 + $0x10] sm:$0xff]   ;;  %v1983_v56 = vld [vmem:[#allocation8 + $0x28] sm:$0xff]  }
 0x288   : > { %v812_v63 = vadd.f32 %v1547_v55, %v737_v61  ;;  %v814_v6 = vadd.f32 %v1549_v4, %v808_v62  ;;  %v1981_v55 = vld [vmem:[#allocation8 + $0x18] sm:$0xff]   ;;  %v1984_v57 = vld [vmem:[#allocation8 + $0x30] sm:$0xff]   ;;  %v1560_v61 = vld [vmem:[%s2536_s21 + $0x60] sm:$0xff] }
 0x289   : > { %v1550_v0 = vmul.f32 -1.442695, %v811_v58  ;;  %v1985_v58 = vld [vmem:[#allocation8 + $0x38] sm:$0xff]   ;;  %v1561_v62 = vld [vmem:[%s2536_s21 + $0x68] sm:$0xff] }
 0x28a   : > { %v1551_v3 = vmul.f32 -1.442695, %v812_v63  ;;  %v1552_v13 = vmul.f32 -1.442695, %v814_v6 }
 0x28b   : > { %2002 = vpow2.f32 %v1550_v0 }
 0x28c   : > { %2004 = vpow2.f32 %v1551_v3 }
 0x28d   : > { %2006 = vpow2.f32 %v1552_v13 }
 0x28e   : > { %2008 = vtanh.f32 %v813_v5 }
 0x295   : > { %v2003_v14 = vpop.eup %2002 }
 0x296   : > { %v2005_v15 = vpop.eup %2004  ;;  %v818_v53 = vadd.f32 1.0, %v2003_v14  ;;  %v1563_v14 = vld [vmem:[%s2536_s21 + $0x78] sm:$0xff] }
 0x297   : > { %v824_v18 = vadd.f32 1.0, %v2005_v15  ;;  %v2007_v21 = vpop.eup %2006 }
 0x298   : > { %2010 = vrcp.f32 %v818_v53  ;;  %v2009_v24 = vpop.eup %2008  ;;  %v831_v32 = vadd.f32 1.0, %v2007_v21  ;;  %v1562_v53 = vld [vmem:[%s2536_s21 + $0x70] sm:$0xff] }
 0x299   : > { %2012 = vrcp.f32 %v824_v18 }
 0x29a   : > { %2014 = vrcp.f32 %v831_v32 }
 0x2a2   : > { %v2011_v25 = vpop.eup %2010 }
 0x2a3   : > { %v2013_v26 = vpop.eup %2012  ;;  %v835_v31 = vmul.f32 %v2011_v25, %v2009_v24 }
 0x2a4   : > { %v834_v33 = vmul.f32 %v2013_v26, %v2694_v41  ;;  %v2015_v39 = vpop.eup %2014  ;;  %v1978_v41 = vld [vmem:[#allocation8] sm:$0xff]  }
 0x2a6   : > { %v2740_v36 = vadd.f32 %v835_v31, %v834_v33 }
 0x2a8   : > { %2016 = vtanh.f32 %v2740_v36 }
 0x2b2   : > { %v2017_v43 = vpop.eup %2016 }
 0x2b3   : > { %v2743_v44 = vmul.f32 %v2017_v43, %v2015_v39 }
 0x2b5   : > { %910 = vmatmul.mubr.f32.vlgmr.msra.gmra.mrb[2].mxu0 %v2743_v44  ;;  %981 = vmatmul.mubr.f32.vlgmr.msra.gmra.mrb[6].mxu1 %v2743_v44 }
 0x2b6   : > { %1813 = vmatpush1.bf16.msra.mxu0 %v2560_v10  ;;  %1845 = vmatpush1.bf16.msra.mxu1 %v2623_v59  ;;  %v1554_v10 = vld [vmem:[%s2536_s21 + $0x48] sm:$0xff] }
 0x2b7   : > { %1815 = vmatprep.subr.bf16.mxu0 %v2562_v11  ;;  %1847 = vmatprep.subr.bf16.mxu1 %v2627_v60 }
 0x2b8   : > { %1085 = vmatprep.mubr.f32.mxu0 %v2287_v9  ;;  %1156 = vmatprep.mubr.f32.mxu1 %v2287_v9  ;;  %v1553_v9 = vld [vmem:[%s2536_s21 + $0x40] sm:$0xff] }
 0x2ba   : > { %1817 = vmatpush1.bf16.msra.mxu0 %v2567_v16  ;;  %1849 = vmatpush1.bf16.msra.mxu1 %v2631_v1 }
 0x2bb   : > { %1819 = vmatprep.subr.bf16.mxu0 %v2571_v17  ;;  %1851 = vmatprep.subr.bf16.mxu1 %v2635_v2 }
 0x2be   : > { %1821 = vmatpush1.bf16.msra.mxu0 %v2575_v22  ;;  %1853 = vmatpush1.bf16.msra.mxu1 %v2638_v8 }
 0x2bf   : > { %1823 = vmatprep.subr.bf16.mxu0 %v2579_v23  ;;  %1855 = vmatprep.subr.bf16.mxu1 %v2641_v12 }
 0x2c2   : > { %1825 = vmatpush1.bf16.msra.mxu0 %v2583_v28  ;;  %1857 = vmatpush1.bf16.msra.mxu1 %v2644_v19 }
 0x2c3   : > { %1827 = vmatprep.subr.bf16.mxu0 %v2587_v29  ;;  %1859 = vmatprep.subr.bf16.mxu1 %v2647_v20 }
 0x2c6   : > { %1829 = vmatpush1.bf16.msra.mxu0 %v2591_v34  ;;  %1861 = vmatpush1.bf16.msra.mxu1 %v2650_v27 }
 0x2c7   : > { %1831 = vmatprep.subr.bf16.mxu0 %v2595_v35  ;;  %1863 = vmatprep.subr.bf16.mxu1 %v2653_v30  ;;  %v1556_v35 = vld [vmem:[%s2536_s21 + $0x58] sm:$0xff] }
 0x2ca   : > { %1833 = vmatpush1.bf16.msra.mxu0 %v2599_v40  ;;  %1865 = vmatpush1.bf16.msra.mxu1 %v2656_v37 }
 0x2cb   : > { %1835 = vmatprep.subr.bf16.mxu0 %v2603_v42  ;;  %1867 = vmatprep.subr.bf16.mxu1 %v2659_v38  ;;  %v1555_v42 = vld [vmem:[%s2536_s21 + $0x50] sm:$0xff] }
 0x2ce   : > { %1837 = vmatpush1.bf16.msra.mxu0 %v2607_v48  ;;  %1869 = vmatpush1.bf16.msra.mxu1 %v2662_v45 }
 0x2cf   : > { %1839 = vmatprep.subr.bf16.mxu0 %v2611_v51  ;;  %1871 = vmatprep.subr.bf16.mxu1 %v2665_v46 }
 0x2d2   : > { %1841 = vmatpush1.bf16.msra.mxu0 %v2615_v52  ;;  %1873 = vmatpush1.bf16.msra.mxu1 %v2668_v50  ;;  %v1198_v50 = vpack.c.bf16 %v2743_v44, %v2697_v49  ;;  %v1982_v49 = vld [vmem:[#allocation8 + $0x20] sm:$0xff]  }
 0x2d3   : > { %1598 = vmatprep.subr.bf16.mxu0 %v1978_v41 }
 0x388   : > { %v911_v11 = vpop.f32.mrb[2].mxu0  ;;  %v982_v16 = vpop.f32.mrb[6].mxu1 }
 0x389   : > { %v987_v17 = vadd.f32 %v1553_v9, %v911_v11  ;;  %v913_v22 = vpop.f32.mrb[3].mxu0  ;;  %v984_v23 = vpop.f32.mrb[7].mxu1  ;;  %v989_v51 = vadd.f32 %v1555_v42, %v982_v16 }
 0x38a   : > { %v988_v28 = vadd.f32 %v1554_v10, %v913_v22  ;;  %v990_v40 = vadd.f32 %v1556_v35, %v984_v23 }
 0x38b   : > { %v1557_v29 = vmul.f32 -1.442695, %v987_v17 }
 0x38c   : > { %v1558_v34 = vmul.f32 -1.442695, %v988_v28  ;;  %v1559_v48 = vmul.f32 -1.442695, %v990_v40 }
 0x38d   : > { %2018 = vpow2.f32 %v1557_v29 }
 0x38e   : > { %2020 = vpow2.f32 %v1558_v34 }
 0x38f   : > { %2022 = vpow2.f32 %v1559_v48 }
 0x390   : > { %2024 = vtanh.f32 %v989_v51 }
 0x397   : > { %v2019_v52 = vpop.eup %2018 }
 0x398   : > { %v2021_v59 = vpop.eup %2020  ;;  %v994_v60 = vadd.f32 1.0, %v2019_v52 }
 0x399   : > { %v1000_v1 = vadd.f32 1.0, %v2021_v59  ;;  %v2023_v2 = vpop.eup %2022 }
 0x39a   : > { %2026 = vrcp.f32 %v994_v60  ;;  %v2025_v8 = vpop.eup %2024  ;;  %v1007_v27 = vadd.f32 1.0, %v2023_v2 }
 0x39b   : > { %2028 = vrcp.f32 %v1000_v1 }
 0x39c   : > { %2030 = vrcp.f32 %v1007_v27 }
 0x3a4   : > { %v2027_v12 = vpop.eup %2026 }
 0x3a5   : > { %v2029_v19 = vpop.eup %2028  ;;  %v1011_v20 = vmul.f32 %v2027_v12, %v2025_v8 }
 0x3a6   : > { %v1010_v30 = vmul.f32 %v2029_v19, %v2740_v36  ;;  %v2031_v38 = vpop.eup %2030 }
 0x3a8   : > { %v2784_v37 = vadd.f32 %v1011_v20, %v1010_v30 }
 0x3aa   : > { %2032 = vtanh.f32 %v2784_v37 }
 0x3b4   : > { %v2033_v45 = vpop.eup %2032 }
 0x3b5   : > { %v2787_v46 = vmul.f32 %v2033_v45, %v2031_v38 }
 0x3b7   : > { %1086 = vmatmul.mubr.f32.vlgmr.msra.gmra.mrb[4].mxu0 %v2787_v46  ;;  %1157 = vmatmul.mubr.f32.vlgmr.msra.gmra.mrb[8].mxu1 %v2787_v46 }
 0x3b8   : > { %1614 = vmatprep.mubr.bf16.mxu0 %v1198_v50  ;;  %1599 = vmatpush3.bf16.msra.mxu0 %v1978_v41 }
 0x3b9   : > { %1600 = vmatprep.subr.bf16.mxu0 %v1979_v47 }
 0x3bc   : > { %1601 = vmatpush3.bf16.msra.mxu0 %v1979_v47 }
 0x3bd   : > { %1602 = vmatprep.subr.bf16.mxu0 %v1980_v54 }
 0x3c0   : > { %1603 = vmatpush3.bf16.msra.mxu0 %v1980_v54 }
 0x3c1   : > { %1604 = vmatprep.subr.bf16.mxu0 %v1981_v55 }
 0x3c4   : > { %1605 = vmatpush3.bf16.msra.mxu0 %v1981_v55 }
 0x3c5   : > { %1606 = vmatprep.subr.bf16.mxu0 %v1982_v49 }
 0x3c8   : > { %1607 = vmatpush3.bf16.msra.mxu0 %v1982_v49 }
 0x3c9   : > { %1608 = vmatprep.subr.bf16.mxu0 %v1983_v56 }
 0x3cc   : > { %1609 = vmatpush3.bf16.msra.mxu0 %v1983_v56 }
 0x3cd   : > { %1610 = vmatprep.subr.bf16.mxu0 %v1984_v57 }
 0x3d0   : > { %1611 = vmatpush3.bf16.msra.mxu0 %v1984_v57 }
 0x3d1   : > { %1612 = vmatprep.subr.bf16.mxu0 %v1985_v58 }
 0x3d4   : > { %1613 = vmatpush3.bf16.msra.mxu0 %v1985_v58 }
 0x48a   : > { %v1087_v63 = vpop.f32.mrb[4].mxu0  ;;  %v1158_v0 = vpop.f32.mrb[8].mxu1 }
 0x48b   : > { %v1163_v3 = vadd.f32 %v1560_v61, %v1087_v63  ;;  %v1089_v4 = vpop.f32.mrb[5].mxu0  ;;  %v1160_v6 = vpop.f32.mrb[9].mxu1  ;;  %v1165_v21 = vadd.f32 %v1562_v53, %v1158_v0 }
 0x48c   : > { %v1164_v7 = vadd.f32 %v1561_v62, %v1089_v4  ;;  %v1166_v15 = vadd.f32 %v1563_v14, %v1160_v6 }
 0x48d   : > { %v1564_v13 = vmul.f32 -1.442695, %v1163_v3 }
 0x48e   : > { %v1565_v5 = vmul.f32 -1.442695, %v1164_v7  ;;  %v1566_v18 = vmul.f32 -1.442695, %v1166_v15 }
 0x48f   : > { %2034 = vpow2.f32 %v1564_v13 }
 0x490   : > { %2036 = vpow2.f32 %v1565_v5 }
 0x491   : > { %2038 = vpow2.f32 %v1566_v18 }
 0x492   : > { %2040 = vtanh.f32 %v1165_v21 }
 0x499   : > { %v2035_v24 = vpop.eup %2034 }
 0x49a   : > { %v2037_v25 = vpop.eup %2036  ;;  %v1170_v26 = vadd.f32 1.0, %v2035_v24 }
 0x49b   : > { %v1176_v31 = vadd.f32 1.0, %v2037_v25  ;;  %v2039_v32 = vpop.eup %2038 }
 0x49c   : > { %2042 = vrcp.f32 %v1170_v26  ;;  %v2041_v33 = vpop.eup %2040  ;;  %v1183_v44 = vadd.f32 1.0, %v2039_v32 }
 0x49d   : > { %2044 = vrcp.f32 %v1176_v31 }
 0x49e   : > { %2046 = vrcp.f32 %v1183_v44 }
 0x4a6   : > { %v2043_v36 = vpop.eup %2042 }
 0x4a7   : > { %v2045_v39 = vpop.eup %2044  ;;  %v1187_v43 = vmul.f32 %v2043_v36, %v2041_v33 }
 0x4a8   : > { %v1186_v9 = vmul.f32 %v2045_v39, %v2784_v37  ;;  %v2047_v11 = vpop.eup %2046 }
 0x4aa   : > { %v1188_v10 = vadd.f32 %v1187_v43, %v1186_v9 }
 0x4ac   : > { %2048 = vtanh.f32 %v1188_v10  ;;  %1193 = vst [vmem:[#allocation12] sm:$0xff] %v1188_v10 }
 0x4b6   : > { %v2049_v16 = vpop.eup %2048 }
 0x4b7   : > { %v1190_v17 = vmul.f32 %v2049_v16, %v2047_v11 }
 0x4b9   : > { %v1199_v22 = vpack.c.bf16 %v1190_v17, %v2787_v46  ;;  %1192 = vst [vmem:[#allocation10] sm:$0xff] %v1190_v17 }
 0x4bb   : > { %1615 = vmatmul.mubr.bf16.vlgmr.msra.gmra.mrb[8].mxu0 %v1199_v22 }
 0x4bc   : > { %2149 = shalt.err (!%p2146_p1)
}
 0x4bd   : > { %s2150_s22 = scalar_lea.hbm %s2909_s7, 128 }
 0x4be   : > { %p2151_p13 = scmp.ne.s32.totalorder %s2909_s7, %s2150_s22  ;;  %p2156_p2 = scmp.lt.u32.totalorder %s2150_s22, %s2909_s7 }
 0x4c0   : > { %p2152_p6 = pnand %p2151_p13, %p2937_p0 }
 0x4c2   : > { %p2153_p10 = pneg %p2152_p6 }
 0x4c4   : > { %p2158_p7 = pnand %p2156_p2, %p2153_p10 }
 0x4c6   : > { %2161 = shalt.err (!%p2158_p7)
}
 0x4c7   : > { %1886 = dma.vmem_to_hbm [thread:$0]  (%p2937_p0), %s1356_s27, 128, %s2909_s7, [#allocation11]  }
 0x4c8   : > { %s2289_s13 = smov [#allocation12]  }
 0x4c9   : > { %s1368_s20 = sshll.u32 %s2289_s13, 4  ;;  %s1369_s20 = int_to_ptr.vmem [resolvable:$true] %s1368_s20 }
 0x4ca   : > { %s2162_s6 = scalar_lea.vmem %s1369_s20, 128  ;;  %p2169_p3 = scmp.lt.s32.totalorder %s1369_s20, %s1369_s20 }
 0x4cb   : > { %p2163_p8 = scmp.ne.s32.totalorder %s1369_s20, %s2162_s6  ;;  %p2170_p5 = scmp.lt.s32.totalorder %s2162_s6, %s2162_s6 }
 0x4cd   : > { %p2164_p11 = pnand %p2163_p8, %p2937_p0  ;;  %p2171_p9 = por %p2170_p5, %p2169_p3 }
 0x4cf   : > { %p2165_p4 = pneg %p2164_p11 }
 0x4d1   : > { %p2172_p12 = pnand %p2171_p9, %p2165_p4 }
 0x4d3   : > { %2175 = shalt.err (!%p2172_p12)
}
 0x4d4   : > { %s2176_s21 = scalar_lea.hbm %s2910_s8, 128 }
 0x4d5   : > { %p2177_p1 = scmp.ne.s32.totalorder %s2910_s8, %s2176_s21  ;;  %p2182_p10 = scmp.lt.u32.totalorder %s2176_s21, %s2910_s8 }
 0x4d7   : > { %p2178_p13 = pnand %p2177_p1, %p2937_p0 }
 0x4d9   : > { %p2179_p6 = pneg %p2178_p13 }
 0x4db   : > { %p2184_p2 = pnand %p2182_p10, %p2179_p6 }
 0x4dd   : > { %2187 = shalt.err (!%p2184_p2)
}
 0x4de   : > { %1888 = dma.vmem_to_hbm [thread:$0]  (%p2937_p0), %s1369_s20, 128, %s2910_s8, [#allocation11]   ;;  %v1567_v23 = vld [vmem:[%s2905_s3] ss:$0 sm:$0xff] }
 0x4df   : > { %s1587_s18 = sshll.u32 %s2270_s30, 9  ;;  %s1339_s22 = sshll.u32 %s2547_s23, 4  ;;  %s2846_s22 = int_to_ptr.vmem [resolvable:$true] %s1339_s22 }
 0x4e0   : > { %s2938_s17 = sld [smem:[#allocation19_spill]]  ;;  %s1325_s30 = scalar_lea.sflag [#allocation5], %s2532_s25 }
 0x4e1   : > { %s2188_s24 = scalar_lea.vmem %s2846_s22, 512  ;;  %p2939_p8 = scmp.ne.s32.totalorder %s2931_s12, 0 }
 0x4e2   : > { %p2189_p7 = scmp.ne.s32.totalorder %s2846_s22, %s2188_s24  ;;  %s2290_s16 = smov [#allocation9]  }
 0x4e3   : > { %s2192_s11 = sshll.u32 %s2290_s16, 4  ;;  %s2193_s11 = int_to_ptr.vmem [resolvable:$false] %s2192_s11 }
 0x4e4   : > { %p2190_p11 = pnand %p2189_p7, %p2939_p8  ;;  %s2194_s15 = scalar_lea.vmem %s2193_s11, 1024 }
 0x4e5   : > { %p2195_p3 = scmp.lt.s32.totalorder %s2846_s22, %s2193_s11  ;;  %p2196_p5 = scmp.lt.s32.totalorder %s2194_s15, %s2188_s24 }
 0x4e6   : > { %s2844_s27 = scalar_lea.hbm %s2938_s17, %s1587_s18  ;;  %p2191_p4 = pneg %p2190_p11 }
 0x4e7   : > { %p2197_p9 = por %p2196_p5, %p2195_p3 }
 0x4e9   : > { %p2198_p12 = pnand %p2197_p9, %p2191_p4 }
 0x58e   : > { %v1616_v28 = vpop.f32.mrb[8].mxu0 }
 0x58f   : > { %v1314_v29 = vadd.f32 %v1616_v28, %v1567_v23  ;;  %v1305_v34 = vpop.f32.mrb[9].mxu0 }
 0x590   : > { %v1306_v35 = vadd.f32 %v1567_v23, %v1305_v34  ;;  %v1617_v40 = vpop.f32.mrb[10].mxu0 }
 0x591   : > { %1322 = vst [vmem:[%s2547_s23 + $0x10] sm:$0xff] %v1314_v29  ;;  %v1317_v42 = vadd.f32 %v1617_v40, %v1567_v23  ;;  %v1308_v48 = vpop.f32.mrb[11].mxu0 }
 0x592   : > { %1320 = vst [vmem:[%s2547_s23] sm:$0xff] %v1306_v35  ;;  %v1309_v51 = vadd.f32 %v1567_v23, %v1308_v48 }
 0x593   : > { %1323 = vst [vmem:[%s2547_s23 + $0x18] sm:$0xff] %v1317_v42 }
 0x594   : > { %1321 = vst [vmem:[%s2547_s23 + $0x8] sm:$0xff] %v1309_v51 }
 0x595   : > { %2201 = shalt.err (!%p2198_p12)
}
 0x596   : > { %s2202_s23 = scalar_lea.hbm %s2844_s27, 512  ;;  %s2206_s18 = scalar_lea.hbm %s2938_s17, 1024 }
 0x597   : > { %p2203_p1 = scmp.ne.s32.totalorder %s2844_s27, %s2202_s23  ;;  %p2207_p10 = scmp.lt.u32.totalorder %s2844_s27, %s2938_s17 }
 0x598   : > { %p2208_p2 = scmp.lt.u32.totalorder %s2206_s18, %s2202_s23  ;;  %p2210_p11 = scmp.lt.u32.totalorder %s2202_s23, %s2844_s27 }
 0x599   : > { %p2204_p13 = pnand %p2203_p1, %p2939_p8 }
 0x59a   : > { %p2209_p7 = por %p2208_p2, %p2207_p10 }
 0x59b   : > { %p2205_p6 = pneg %p2204_p13 }
 0x59c   : > { %p2211_p4 = por %p2210_p11, %p2209_p7 }
 0x59e   : > { %p2212_p3 = pnand %p2211_p4, %p2205_p6 }
 0x5a0   : > { %2215 = shalt.err (!%p2212_p3)
}
 0x5a1   : > { %s2291_s24 = smov 128   ;;  %s2292_s16 = smov 8  }
 0x5a2   : > { %1884 = dma.vmem_to_hbm [thread:$0]  (%p2939_p8), %s2846_s22, 512, %s2844_s27, %s1325_s30, %s2291_s24, %s2291_s24, %s2292_s16  }
 0x5a3   : > { %2249 = dma.done.wait (%p2937_p0), [#allocation11], 256  }
 0x5a4   : > { %2251 = vsyncadd (%p2937_p0), [#allocation11], 4294967040 }
 0x5a5 PF: > { %s2940_s11 = sld [smem:[#allocation17_spill]]  ;;  %s2941_s15 = sld [smem:[#allocation18_spill]] }
 0x5a6   : > { %p2943_p9 = scmp.ge.s32.totalorder %s2278_s10, 2 }
 0x5ab   : > { %s1388_s23 = sand.u32 1, %s2940_s11   ;;  %p2942_p5 = scmp.ne.s32.totalorder %s2941_s15, 0 }
 0x5ac   : > { %s1389_s13 = scalar_lea.sflag [#allocation5], %s1388_s23 }
 0x5ad   : > { %p1906_p12 = pnand %p2943_p9, %p2942_p5 }
 0x5af   : > { %2253 = dma.done.wait (!%p1906_p12), %s1389_s13, 512  }
 0x5b0   : > { %2255 = vsyncadd (!%p1906_p12), %s1389_s13, 4294966784  ;;  %s27_s10 = sadd.s32 1, %s2278_s10   ;;  %s2944_s27 = smov %s2262_s28 }
 0x5b1   : > { %p24_p1 = scmp.ge.s32.totalorder %s27_s10, 4   ;;  %s2945_s28 = smov %s2266_s29 }
 0x5b2   : > { %s2946_s29 = smov %s2483_s19  ;;  %s2947_s30 = smov %s2274_s9 }
 0x5b3   : > { %s2948_s9 = smov %s2950_s26  ;;  %26 = sbr.rel (!%p24_p1) target bundleno = 10 (0xa), region = 128 }
 0x5ba   :  { %1394 = vsyncpa [#allocation4], 1 }
 0x5bb   :  { %1396 = vsyncpa [#allocation4 + $0x1], 1 }
 0x5bc   :  { %1397 = vsyncpa [#allocation7], 1 }
 0x5bd   :  { %1398 = vsyncpa [#allocation5], 1 }
 0x5be   :  { %1400 = vsyncpa [#allocation5 + $0x1], 1 }
 0x5bf   :  { %1401 = vsyncpa [#allocation11], 1 }

</bundles_post_ra>
